<compile_context>
chip_gen: v7x
topology: tpu7x:2x2x1
jax: 0.10.0
libtpu: 0.0.40
codegen_flags: <defaults>
</compile_context>

<pallas_src>
import functools

import jax
import jax.numpy as jnp
from jax.experimental import pallas as pl
from jax.experimental.pallas import tpu as pltpu

_LANE = 128     # lane-tile width
_ROW = 16       # row (sublane) alignment used inside the packed weight slabs


def _round_up(x, m):
    return ((x + m - 1) // m) * m


def prepare_params(params, num_inputs, weights_dtype=jnp.bfloat16):
    """One-time folding of PyTorch-shaped weights into two packed MXU slabs.

    Returns ((conv_slab, lin_slab), cfg).  conv_slab holds, per block and at
    16-row-aligned offsets:
      * wwide1: columns [0:c_pad]       = tap on x[t-d]     (w1[:, :, 0].T)
                columns [c_pad:2c_pad]  = tap on x[t]       (w1[:, :, 1].T)
                columns [2c_pad:3c_pad] = 1x1 downsample    (wd[:, :, 0].T)
                                          or identity when the first block has
                                          no downsample but needs width lift
      * a bias row-block (b1 / b2 / bd)
      * wwide2: the same two-tap layout for the second conv.
    lin_slab holds the head weight with rows permuted from PyTorch's
    channel-major flatten (c*L + l) to the kernel's time-major padded layout
    (l*c_pad + c), zero-padded to 128 output lanes, plus a bias row.
    """
    blocks = params["blocks"]
    L = num_inputs
    num_ch = [int(b["w1"].shape[0]) for b in blocks]
    cin0 = int(blocks[0]["w1"].shape[1])
    c_pad = _round_up(max(num_ch), _LANE)          # common padded channel width

    any_third = any(b.get("wd") is not None for b in blocks) or (
        blocks[0].get("wd") is None and cin0 != c_pad)
    slab_w = (3 if any_third else 2) * c_pad

    sections, meta, r = [], [], 0
    for i, blk in enumerate(blocks):
        w1, b1 = blk["w1"], blk["b1"]              # (Cout, Cin, 2), (Cout,)
        w2, b2 = blk["w2"], blk["b2"]
        c_out, c_in = int(w1.shape[0]), int(w1.shape[1])
        assert w1.shape[2] == 2 and w2.shape[2] == 2, "only kernel_size=2 supported"
        # TODO(synk): kernel_size != 2 would need per-tap column groups here.
        has_ds = blk.get("wd") is not None
        # If the first block has no downsample but its (unpadded) input width
        # differs from c_pad, inject an identity "downsample" so the residual
        # is produced by the same matmul and no in-kernel padding is needed.
        inject_id = (i == 0) and (not has_ds) and (c_in != c_pad)
        third = has_ds or inject_id
        w1_width = (3 if third else 2) * c_pad
        k = c_in if i == 0 else c_pad              # conv1 contraction width

        ww1 = jnp.zeros((_round_up(k, _ROW), slab_w), jnp.float32)
        ww1 = ww1.at[:c_in, 0:c_out].set(w1[:, :, 0].T)
        ww1 = ww1.at[:c_in, c_pad:c_pad + c_out].set(w1[:, :, 1].T)
        if has_ds:
            ww1 = ww1.at[:c_in, 2 * c_pad:2 * c_pad + c_out].set(blk["wd"][:, :, 0].T)
        elif inject_id:
            ww1 = ww1.at[:c_in, 2 * c_pad:2 * c_pad + c_out].set(
                jnp.eye(c_in, c_out, dtype=jnp.float32))

        bb = jnp.zeros((_ROW, slab_w), jnp.float32)
        bb = bb.at[0, :c_out].set(b1)
        bb = bb.at[1, :c_out].set(b2)
        if has_ds:
            bb = bb.at[2, :c_out].set(blk["bd"])

        ww2 = jnp.zeros((c_pad, slab_w), jnp.float32)
        ww2 = ww2.at[:c_out, 0:c_out].set(w2[:, :, 0].T)
        ww2 = ww2.at[:c_out, c_pad:c_pad + c_out].set(w2[:, :, 1].T)

        off_w1 = r
        off_b = off_w1 + ww1.shape[0]
        off_w2 = off_b + _ROW
        r = off_w2 + c_pad
        sections += [ww1, bb, ww2]
        meta.append(dict(dilation=2 ** i, k=k, w1_width=w1_width,
                         off_w1=off_w1, off_b=off_b, off_w2=off_w2,
                         res_in_matmul=third))
    conv_slab = jnp.concatenate(sections, axis=0).astype(weights_dtype)

    lin_w, lin_b = params["lin_w"], params["lin_b"]    # (Fout, Fin), (Fout,)
    fout, fin = int(lin_w.shape[0]), int(lin_w.shape[1])
    c_last = num_ch[-1]
    assert fin == c_last * L, "Linear in_features must equal C_last * num_inputs"
    f_pad = _round_up(fout, _LANE)
    wp = lin_w.T.reshape(c_last, L, fout).transpose(1, 0, 2)   # (L, c_last, Fout)
    lin_w3 = jnp.zeros((L, c_pad, f_pad), jnp.float32).at[:, :c_last, :fout].set(wp)
    lin_rows = L * c_pad
    lb = jnp.zeros((_ROW, f_pad), jnp.float32).at[0, :fout].set(lin_b)
    lin_slab = jnp.concatenate([lin_w3.reshape(lin_rows, f_pad), lb],
                               axis=0).astype(weights_dtype)

    cfg = dict(block_meta=tuple(meta), L=L, cin0=cin0, c_pad=c_pad,
               f_pad=f_pad, fout=fout, lin_rows=lin_rows)
    return (conv_slab, lin_slab), cfg


def _tcn_fused_kernel(x_ref, conv_ref, lin_ref, o_ref, *,
                      block_meta, L, Bt, c_pad, lin_rows, compute_dtype):
    """Fused TCN + Linear head for one (Bt, L, Cin0) batch slab.

    x_ref: (Bt, L, Cin0) channels-last.  conv_ref / lin_ref: packed weight
    slabs (see prepare_params).  o_ref: (1, Bt, f_pad).
    """
    M = Bt * L
    cin0 = x_ref.shape[-1]

    # (Bt, L, Cin0) -> (Bt*L, Cin0): leading-dim merge only (trivial for Bt=1,
    # layout-preserving when L is a multiple of 8).
    h = x_ref[...].reshape(M, cin0).astype(jnp.float32)

    # Per-row time index, built once and reused by every block's causal mask.
    # With batch folded into rows it is taken modulo L, so rows that
    # pltpu.roll wraps across batch boundaries are always masked to zero.
    t_idx = jax.lax.broadcasted_iota(jnp.int32, (M, c_pad), 0)
    if Bt > 1:
        t_idx = t_idx % L

    for bm in block_meta:
        d = bm["dilation"]
        w1 = conv_ref[bm["off_w1"]:bm["off_w1"] + bm["k"], 0:bm["w1_width"]]
        w2 = conv_ref[bm["off_w2"]:bm["off_w2"] + c_pad, 0:2 * c_pad]
        bias = conv_ref[bm["off_b"]:bm["off_b"] + _ROW, 0:c_pad].astype(jnp.float32)
        keep = t_idx >= d

        # conv1 (+ fused downsample / identity residual): ONE merged matmul.
        y = jnp.dot(h.astype(compute_dtype), w1,
                    preferred_element_type=jnp.float32)        # (M, 2|3 * c_pad)
        y0 = jnp.where(keep, pltpu.roll(y[:, 0:c_pad], shift=d, axis=0), 0.0)
        h1 = jnp.maximum(y0 + y[:, c_pad:2 * c_pad] + bias[0:1, :], 0.0)
        # TODO(synk): nn.Dropout is an eval-mode no-op; training dropout omitted.

        res = (y[:, 2 * c_pad:3 * c_pad] + bias[2:3, :]) if bm["res_in_matmul"] else h

        # conv2: one merged-tap matmul.
        z = jnp.dot(h1.astype(compute_dtype), w2,
                    preferred_element_type=jnp.float32)        # (M, 2*c_pad)
        z0 = jnp.where(keep, pltpu.roll(z[:, 0:c_pad], shift=d, axis=0), 0.0)
        h2 = jnp.maximum(z0 + z[:, c_pad:2 * c_pad] + bias[1:2, :], 0.0)

        h = jnp.maximum(h2 + res, 0.0)                         # (M, c_pad)

    # Linear head as ONE matmul.  The per-batch time-major flatten is built
    # from whole 128-lane row pieces + a lane-tile-aligned concat (no
    # sublane->lane reshape, no chain of M=1 matmuls).
    if Bt == 1:
        flat = jnp.concatenate([h[l:l + 1, :] for l in range(L)], axis=1)
    else:
        h3 = h.reshape(Bt, L, c_pad)
        flat = jnp.concatenate([h3[:, l, :] for l in range(L)], axis=1)
    lw = lin_ref[0:lin_rows, :]
    lb = lin_ref[lin_rows:lin_rows + 1, :].astype(jnp.float32)
    out = jnp.dot(flat.astype(compute_dtype), lw,
                  preferred_element_type=jnp.float32) + lb     # (Bt, f_pad)
    o_ref[0] = out


def _pick_batch_tile(B, L, target_rows=128):
    """Batch elements per grid step: fill ~128 MXU rows, keep >=2 grid steps
    (for v7x's two TensorCores), and divide B exactly (no batch padding)."""
    bt = max(1, min(B, max(1, target_rows // max(L, 1))))
    if B > 1:
        bt = min(bt, (B + 1) // 2)
    while B % bt:
        bt -= 1
    return bt


def temporal_conv_net_forward(prepped, source, pred_len):
    """source: (B, seq_len, num_inputs) — Conv1d sees channels = seq_len."""
    (conv_slab, lin_slab), cfg = prepped
    B, cin0, L = source.shape
    assert cin0 == cfg["cin0"] and L == cfg["L"]
    c_pad, f_pad, fout = cfg["c_pad"], cfg["f_pad"], cfg["fout"]

    bt = _pick_batch_tile(B, L)
    G = B // bt

    # PyTorch NCL -> channels-last.  Kept outside the kernel deliberately: the
    # input is a few KB, XLA fuses the transpose with the cast, and it avoids
    # an in-kernel sub-128-lane transpose.
    # TODO(synk): accept channels-last input upstream to drop this op entirely.
    x_cl = jnp.transpose(source, (0, 2, 1)).astype(jnp.float32)

    kernel = functools.partial(
        _tcn_fused_kernel, block_meta=cfg["block_meta"], L=L, Bt=bt,
        c_pad=c_pad, lin_rows=cfg["lin_rows"], compute_dtype=conv_slab.dtype)

    out = pl.pallas_call(
        kernel,
        out_shape=jax.ShapeDtypeStruct((G, bt, f_pad), jnp.float32),
        grid=(G,),
        in_specs=[
            pl.BlockSpec((bt, L, cin0), lambda g: (g, 0, 0)),
            pl.BlockSpec(conv_slab.shape, lambda g: (0, 0)),   # resident, 1 DMA
            pl.BlockSpec(lin_slab.shape, lambda g: (0, 0)),    # resident, 1 DMA
        ],
        out_specs=pl.BlockSpec((1, bt, f_pad), lambda g: (g, 0, 0)),
        compiler_params=pltpu.CompilerParams(dimension_semantics=("parallel",)),
    )(x_cl, conv_slab, lin_slab)

    out = out.reshape(B, f_pad)[:, :fout]
    # Mirrors PyTorch: output.reshape(-1, pred_len, source.shape[-1]).
    # (Assumes num_outputs == source.shape[-1], as in the reference module.)
    return out.reshape(-1, pred_len, source.shape[-1])


def init_params(key, seq_len, pred_len, num_inputs, num_outputs, num_channels,
                kernel_size=2):
    """Deterministic synthetic weights in PyTorch shapes (weight_norm folded;
    valid for fresh init where g = ||v|| so the effective weight equals v)."""
    blocks = []
    k = key
    for i, out_ch in enumerate(num_channels):
        in_ch = seq_len if i == 0 else num_channels[i - 1]
        k, k1, k2, k3, k4, k5, k6 = jax.random.split(k, 7)
        blk = {
            "w1": 0.1 * jax.random.normal(k1, (out_ch, in_ch, kernel_size), jnp.float32),
            "b1": 0.1 * jax.random.normal(k2, (out_ch,), jnp.float32),
            "w2": 0.1 * jax.random.normal(k3, (out_ch, out_ch, kernel_size), jnp.float32),
            "b2": 0.1 * jax.random.normal(k4, (out_ch,), jnp.float32),
        }
        if in_ch != out_ch:
            blk["wd"] = 0.1 * jax.random.normal(k5, (out_ch, in_ch, 1), jnp.float32)
            blk["bd"] = 0.1 * jax.random.normal(k6, (out_ch,), jnp.float32)
        blocks.append(blk)
    k, kw, kb = jax.random.split(k, 3)
    fin = num_channels[-1] * num_inputs
    fout = pred_len * num_outputs
    return {
        "blocks": blocks,
        "lin_w": 0.05 * jax.random.normal(kw, (fout, fin), jnp.float32),
        "lin_b": 0.05 * jax.random.normal(kb, (fout,), jnp.float32),
    }


if __name__ == "__main__":
    B = 2
    seq_len = 16        # Conv1d in_channels of the first block
    num_inputs = 16     # temporal length seen by Conv1d (= source.shape[-1])
    pred_len = 4
    num_outputs = 16    # == num_inputs so the reference's final reshape is consistent
    num_channels = [32, 32]

    key = jax.random.PRNGKey(0)
    k_src, k_par = jax.random.split(key)
    source = jax.random.normal(k_src, (B, seq_len, num_inputs), jnp.float32)
    params = init_params(k_par, seq_len, pred_len, num_inputs, num_outputs,
                         num_channels, kernel_size=2)

    # One-time weight packing (bf16 MXU operands; pass jnp.float32 for exact f32).
    prepped = prepare_params(params, num_inputs, weights_dtype=jnp.bfloat16)

    out = temporal_conv_net_forward(prepped, source, pred_len)
    out = jax.block_until_ready(out)
    assert out.shape == (B, pred_len, num_inputs), out.shape
    assert out.dtype == jnp.float32
    print("KERNEL_OK")
</pallas_src>

<mosaic_0001>
module attributes {stable_mosaic.version = 11 : i64} {
  func.func @_tcn_fused_kernel(%arg0: i32, %arg1: memref<1x16x16xf32, #tpu.memory_space<vmem>>, %arg2: memref<432x384xbf16, #tpu.memory_space<vmem>>, %arg3: memref<2064x128xbf16, #tpu.memory_space<vmem>>, %arg4: memref<1x1x128xf32, #tpu.memory_space<vmem>>) attributes {dimension_semantics = [#tpu.dimension_semantics<parallel>], iteration_bounds = array<i64: 2>, scalar_prefetch = 0 : i64, scratch_operands = 0 : i64, tpu.core_type = #tpu.core_type<tc>, window_params = [{transform_indices = @transform_0, window_bounds = array<i64: 1, 16, 16>}, {pipeline_mode = #tpu.pipeline_mode<synchronous>, transform_indices = @transform_1, window_bounds = array<i64: 432, 384>}, {pipeline_mode = #tpu.pipeline_mode<synchronous>, transform_indices = @transform_2, window_bounds = array<i64: 2064, 128>}, {transform_indices = @transform_3, window_bounds = array<i64: 1, 1, 128>}]} {
    %c0 = arith.constant 0 : index
    %c0_0 = arith.constant 0 : index
    %c0_1 = arith.constant 0 : index
    %0 = vector.load %arg1[%c0, %c0_0, %c0_1] : memref<1x16x16xf32, #tpu.memory_space<vmem>>, vector<1x16x16xf32>
    %1 = vector.shape_cast %0 : vector<1x16x16xf32> to vector<16x16xf32>
    %2 = tpu.iota {dimensions = array<i32: 0>} : vector<16x128xi32>
    %c0_2 = arith.constant 0 : index
    %c0_3 = arith.constant 0 : index
    %3 = vector.load %arg2[%c0_2, %c0_3] : memref<432x384xbf16, #tpu.memory_space<vmem>>, vector<16x384xbf16>
    %c32 = arith.constant 32 : index
    %c0_4 = arith.constant 0 : index
    %4 = vector.load %arg2[%c32, %c0_4] : memref<432x384xbf16, #tpu.memory_space<vmem>>, vector<128x256xbf16>
    %c16 = arith.constant 16 : index
    %c0_5 = arith.constant 0 : index
    %5 = vector.load %arg2[%c16, %c0_5] : memref<432x384xbf16, #tpu.memory_space<vmem>>, vector<16x128xbf16>
    %6 = arith.extf %5 : vector<16x128xbf16> to vector<16x128xf32>
    %c1_i32 = arith.constant 1 : i32
    %7 = vector.broadcast %c1_i32 : i32 to vector<16x128xi32>
    %8 = arith.cmpi sge, %2, %7 : vector<16x128xi32>
    %9 = arith.truncf %1 : vector<16x16xf32> to vector<16x16xbf16>
    %cst = arith.constant dense<0.000000e+00> : vector<16x384xf32>
    %10 = tpu.matmul %9, %3, %cst {dimension_numbers = #tpu.dot_dimension_numbers<[1], [0], [0], [1], [0, 0, 1, 1], [], []>} : vector<16x16xbf16>, vector<16x384xbf16>, vector<16x384xf32> -> vector<16x384xf32>
    %11 = vector.extract_strided_slice %10 {offsets = [0, 0], sizes = [16, 128], strides = [1, 1]} : vector<16x384xf32> to vector<16x128xf32>
    %c1_i32_6 = arith.constant 1 : i32
    %12 = tpu.dynamic_rotate %11 by %c1_i32_6 dim 0 : vector<16x128xf32>, i32 -> vector<16x128xf32>
    %cst_7 = arith.constant 0.000000e+00 : f32
    %13 = vector.broadcast %cst_7 : f32 to vector<16x128xf32>
    %14 = arith.select %8, %12, %13 : vector<16x128xi1>, vector<16x128xf32>
    %15 = vector.extract_strided_slice %10 {offsets = [0, 128], sizes = [16, 128], strides = [1, 1]} : vector<16x384xf32> to vector<16x128xf32>
    %16 = arith.addf %14, %15 : vector<16x128xf32>
    %17 = vector.extract_strided_slice %6 {offsets = [0, 0], sizes = [1, 128], strides = [1, 1]} : vector<16x128xf32> to vector<1x128xf32>
    %18 = vector.broadcast %17 : vector<1x128xf32> to vector<16x128xf32>
    %19 = arith.addf %16, %18 : vector<16x128xf32>
    %cst_8 = arith.constant 0.000000e+00 : f32
    %20 = vector.broadcast %cst_8 : f32 to vector<16x128xf32>
    %21 = arith.maximumf %19, %20 : vector<16x128xf32>
    %22 = vector.extract_strided_slice %10 {offsets = [0, 256], sizes = [16, 128], strides = [1, 1]} : vector<16x384xf32> to vector<16x128xf32>
    %23 = vector.extract_strided_slice %6 {offsets = [2, 0], sizes = [1, 128], strides = [1, 1]} : vector<16x128xf32> to vector<1x128xf32>
    %24 = vector.broadcast %23 : vector<1x128xf32> to vector<16x128xf32>
    %25 = arith.addf %22, %24 : vector<16x128xf32>
    %26 = arith.truncf %21 : vector<16x128xf32> to vector<16x128xbf16>
    %cst_9 = arith.constant dense<0.000000e+00> : vector<16x256xf32>
    %27 = tpu.matmul %26, %4, %cst_9 {dimension_numbers = #tpu.dot_dimension_numbers<[1], [0], [0], [1], [0, 0, 1, 1], [], []>} : vector<16x128xbf16>, vector<128x256xbf16>, vector<16x256xf32> -> vector<16x256xf32>
    %28 = vector.extract_strided_slice %27 {offsets = [0, 0], sizes = [16, 128], strides = [1, 1]} : vector<16x256xf32> to vector<16x128xf32>
    %c1_i32_10 = arith.constant 1 : i32
    %29 = tpu.dynamic_rotate %28 by %c1_i32_10 dim 0 : vector<16x128xf32>, i32 -> vector<16x128xf32>
    %cst_11 = arith.constant 0.000000e+00 : f32
    %30 = vector.broadcast %cst_11 : f32 to vector<16x128xf32>
    %31 = arith.select %8, %29, %30 : vector<16x128xi1>, vector<16x128xf32>
    %32 = vector.extract_strided_slice %27 {offsets = [0, 128], sizes = [16, 128], strides = [1, 1]} : vector<16x256xf32> to vector<16x128xf32>
    %33 = arith.addf %31, %32 : vector<16x128xf32>
    %34 = vector.extract_strided_slice %6 {offsets = [1, 0], sizes = [1, 128], strides = [1, 1]} : vector<16x128xf32> to vector<1x128xf32>
    %35 = vector.broadcast %34 : vector<1x128xf32> to vector<16x128xf32>
    %36 = arith.addf %33, %35 : vector<16x128xf32>
    %cst_12 = arith.constant 0.000000e+00 : f32
    %37 = vector.broadcast %cst_12 : f32 to vector<16x128xf32>
    %38 = arith.maximumf %36, %37 : vector<16x128xf32>
    %39 = arith.addf %38, %25 : vector<16x128xf32>
    %cst_13 = arith.constant 0.000000e+00 : f32
    %40 = vector.broadcast %cst_13 : f32 to vector<16x128xf32>
    %41 = arith.maximumf %39, %40 : vector<16x128xf32>
    %c160 = arith.constant 160 : index
    %c0_14 = arith.constant 0 : index
    %42 = vector.load %arg2[%c160, %c0_14] : memref<432x384xbf16, #tpu.memory_space<vmem>>, vector<128x256xbf16>
    %c304 = arith.constant 304 : index
    %c0_15 = arith.constant 0 : index
    %43 = vector.load %arg2[%c304, %c0_15] : memref<432x384xbf16, #tpu.memory_space<vmem>>, vector<128x256xbf16>
    %c288 = arith.constant 288 : index
    %c0_16 = arith.constant 0 : index
    %44 = vector.load %arg2[%c288, %c0_16] : memref<432x384xbf16, #tpu.memory_space<vmem>>, vector<16x128xbf16>
    %45 = arith.extf %44 : vector<16x128xbf16> to vector<16x128xf32>
    %c2_i32 = arith.constant 2 : i32
    %46 = vector.broadcast %c2_i32 : i32 to vector<16x128xi32>
    %47 = arith.cmpi sge, %2, %46 : vector<16x128xi32>
    %48 = arith.truncf %41 : vector<16x128xf32> to vector<16x128xbf16>
    %cst_17 = arith.constant dense<0.000000e+00> : vector<16x256xf32>
    %49 = tpu.matmul %48, %42, %cst_17 {dimension_numbers = #tpu.dot_dimension_numbers<[1], [0], [0], [1], [0, 0, 1, 1], [], []>} : vector<16x128xbf16>, vector<128x256xbf16>, vector<16x256xf32> -> vector<16x256xf32>
    %50 = vector.extract_strided_slice %49 {offsets = [0, 0], sizes = [16, 128], strides = [1, 1]} : vector<16x256xf32> to vector<16x128xf32>
    %c2_i32_18 = arith.constant 2 : i32
    %51 = tpu.dynamic_rotate %50 by %c2_i32_18 dim 0 : vector<16x128xf32>, i32 -> vector<16x128xf32>
    %cst_19 = arith.constant 0.000000e+00 : f32
    %52 = vector.broadcast %cst_19 : f32 to vector<16x128xf32>
    %53 = arith.select %47, %51, %52 : vector<16x128xi1>, vector<16x128xf32>
    %54 = vector.extract_strided_slice %49 {offsets = [0, 128], sizes = [16, 128], strides = [1, 1]} : vector<16x256xf32> to vector<16x128xf32>
    %55 = arith.addf %53, %54 : vector<16x128xf32>
    %56 = vector.extract_strided_slice %45 {offsets = [0, 0], sizes = [1, 128], strides = [1, 1]} : vector<16x128xf32> to vector<1x128xf32>
    %57 = vector.broadcast %56 : vector<1x128xf32> to vector<16x128xf32>
    %58 = arith.addf %55, %57 : vector<16x128xf32>
    %cst_20 = arith.constant 0.000000e+00 : f32
    %59 = vector.broadcast %cst_20 : f32 to vector<16x128xf32>
    %60 = arith.maximumf %58, %59 : vector<16x128xf32>
    %61 = arith.truncf %60 : vector<16x128xf32> to vector<16x128xbf16>
    %cst_21 = arith.constant dense<0.000000e+00> : vector<16x256xf32>
    %62 = tpu.matmul %61, %43, %cst_21 {dimension_numbers = #tpu.dot_dimension_numbers<[1], [0], [0], [1], [0, 0, 1, 1], [], []>} : vector<16x128xbf16>, vector<128x256xbf16>, vector<16x256xf32> -> vector<16x256xf32>
    %63 = vector.extract_strided_slice %62 {offsets = [0, 0], sizes = [16, 128], strides = [1, 1]} : vector<16x256xf32> to vector<16x128xf32>
    %c2_i32_22 = arith.constant 2 : i32
    %64 = tpu.dynamic_rotate %63 by %c2_i32_22 dim 0 : vector<16x128xf32>, i32 -> vector<16x128xf32>
    %cst_23 = arith.constant 0.000000e+00 : f32
    %65 = vector.broadcast %cst_23 : f32 to vector<16x128xf32>
    %66 = arith.select %47, %64, %65 : vector<16x128xi1>, vector<16x128xf32>
    %67 = vector.extract_strided_slice %62 {offsets = [0, 128], sizes = [16, 128], strides = [1, 1]} : vector<16x256xf32> to vector<16x128xf32>
    %68 = arith.addf %66, %67 : vector<16x128xf32>
    %69 = vector.extract_strided_slice %45 {offsets = [1, 0], sizes = [1, 128], strides = [1, 1]} : vector<16x128xf32> to vector<1x128xf32>
    %70 = vector.broadcast %69 : vector<1x128xf32> to vector<16x128xf32>
    %71 = arith.addf %68, %70 : vector<16x128xf32>
    %cst_24 = arith.constant 0.000000e+00 : f32
    %72 = vector.broadcast %cst_24 : f32 to vector<16x128xf32>
    %73 = arith.maximumf %71, %72 : vector<16x128xf32>
    %74 = arith.addf %73, %41 : vector<16x128xf32>
    %cst_25 = arith.constant 0.000000e+00 : f32
    %75 = vector.broadcast %cst_25 : f32 to vector<16x128xf32>
    %76 = arith.maximumf %74, %75 : vector<16x128xf32>
    %77 = vector.extract_strided_slice %76 {offsets = [0, 0], sizes = [1, 128], strides = [1, 1]} : vector<16x128xf32> to vector<1x128xf32>
    %78 = vector.extract_strided_slice %76 {offsets = [1, 0], sizes = [1, 128], strides = [1, 1]} : vector<16x128xf32> to vector<1x128xf32>
    %79 = vector.extract_strided_slice %76 {offsets = [2, 0], sizes = [1, 128], strides = [1, 1]} : vector<16x128xf32> to vector<1x128xf32>
    %80 = vector.extract_strided_slice %76 {offsets = [3, 0], sizes = [1, 128], strides = [1, 1]} : vector<16x128xf32> to vector<1x128xf32>
    %81 = vector.extract_strided_slice %76 {offsets = [4, 0], sizes = [1, 128], strides = [1, 1]} : vector<16x128xf32> to vector<1x128xf32>
    %82 = vector.extract_strided_slice %76 {offsets = [5, 0], sizes = [1, 128], strides = [1, 1]} : vector<16x128xf32> to vector<1x128xf32>
    %83 = vector.extract_strided_slice %76 {offsets = [6, 0], sizes = [1, 128], strides = [1, 1]} : vector<16x128xf32> to vector<1x128xf32>
    %84 = vector.extract_strided_slice %76 {offsets = [7, 0], sizes = [1, 128], strides = [1, 1]} : vector<16x128xf32> to vector<1x128xf32>
    %85 = vector.extract_strided_slice %76 {offsets = [8, 0], sizes = [1, 128], strides = [1, 1]} : vector<16x128xf32> to vector<1x128xf32>
    %86 = vector.extract_strided_slice %76 {offsets = [9, 0], sizes = [1, 128], strides = [1, 1]} : vector<16x128xf32> to vector<1x128xf32>
    %87 = vector.extract_strided_slice %76 {offsets = [10, 0], sizes = [1, 128], strides = [1, 1]} : vector<16x128xf32> to vector<1x128xf32>
    %88 = vector.extract_strided_slice %76 {offsets = [11, 0], sizes = [1, 128], strides = [1, 1]} : vector<16x128xf32> to vector<1x128xf32>
    %89 = vector.extract_strided_slice %76 {offsets = [12, 0], sizes = [1, 128], strides = [1, 1]} : vector<16x128xf32> to vector<1x128xf32>
    %90 = vector.extract_strided_slice %76 {offsets = [13, 0], sizes = [1, 128], strides = [1, 1]} : vector<16x128xf32> to vector<1x128xf32>
    %91 = vector.extract_strided_slice %76 {offsets = [14, 0], sizes = [1, 128], strides = [1, 1]} : vector<16x128xf32> to vector<1x128xf32>
    %92 = vector.extract_strided_slice %76 {offsets = [15, 0], sizes = [1, 128], strides = [1, 1]} : vector<16x128xf32> to vector<1x128xf32>
    %93 = tpu.concatenate %77, %78, %79, %80, %81, %82, %83, %84, %85, %86, %87, %88, %89, %90, %91, %92 in 1 : vector<1x128xf32>, vector<1x128xf32>, vector<1x128xf32>, vector<1x128xf32>, vector<1x128xf32>, vector<1x128xf32>, vector<1x128xf32>, vector<1x128xf32>, vector<1x128xf32>, vector<1x128xf32>, vector<1x128xf32>, vector<1x128xf32>, vector<1x128xf32>, vector<1x128xf32>, vector<1x128xf32>, vector<1x128xf32> -> vector<1x2048xf32>
    %c0_26 = arith.constant 0 : index
    %c0_27 = arith.constant 0 : index
    %94 = vector.load %arg3[%c0_26, %c0_27] : memref<2064x128xbf16, #tpu.memory_space<vmem>>, vector<2048x128xbf16>
    %c2048 = arith.constant 2048 : index
    %c0_28 = arith.constant 0 : index
    %95 = vector.load %arg3[%c2048, %c0_28] : memref<2064x128xbf16, #tpu.memory_space<vmem>>, vector<1x128xbf16>
    %96 = arith.extf %95 : vector<1x128xbf16> to vector<1x128xf32>
    %97 = arith.truncf %93 : vector<1x2048xf32> to vector<1x2048xbf16>
    %cst_29 = arith.constant dense<0.000000e+00> : vector<1x128xf32>
    %98 = tpu.matmul %97, %94, %cst_29 {dimension_numbers = #tpu.dot_dimension_numbers<[1], [0], [0], [1], [0, 0, 1, 1], [], []>} : vector<1x2048xbf16>, vector<2048x128xbf16>, vector<1x128xf32> -> vector<1x128xf32>
    %99 = arith.addf %98, %96 : vector<1x128xf32>
    %c0_30 = arith.constant 0 : index
    %c0_31 = arith.constant 0 : index
    %c0_32 = arith.constant 0 : index
    %100 = vector.load %arg4[%c0_30, %c0_31, %c0_32] : memref<1x1x128xf32, #tpu.memory_space<vmem>>, vector<1x1x128xf32>
    %101 = vector.shape_cast %100 : vector<1x1x128xf32> to vector<1x128xf32>
    %102 = vector.shape_cast %99 : vector<1x128xf32> to vector<1x1x128xf32>
    tpu.vector_store %arg4[%c0_30, %c0_31, %c0_32], %102 {strides = array<i32>} : memref<1x1x128xf32, #tpu.memory_space<vmem>>, vector<1x1x128xf32>,
    return
  }
  func.func @transform_0(%arg0: i32) -> (i32, i32, i32) {
    %c0_i32 = arith.constant 0 : i32
    %c0_i32_0 = arith.constant 0 : i32
    %c0_i32_1 = arith.constant 0 : i32
    return %arg0, %c0_i32, %c0_i32_0 : i32, i32, i32
  }
  func.func @transform_1(%arg0: i32) -> (i32, i32) {
    %c0_i32 = arith.constant 0 : i32
    %c0_i32_0 = arith.constant 0 : i32
    %c0_i32_1 = arith.constant 0 : i32
    return %c0_i32, %c0_i32_0 : i32, i32
  }
  func.func @transform_2(%arg0: i32) -> (i32, i32) {
    %c0_i32 = arith.constant 0 : i32
    %c0_i32_0 = arith.constant 0 : i32
    %c0_i32_1 = arith.constant 0 : i32
    return %c0_i32, %c0_i32_0 : i32, i32
  }
  func.func @transform_3(%arg0: i32) -> (i32, i32, i32) {
    %c0_i32 = arith.constant 0 : i32
    %c0_i32_0 = arith.constant 0 : i32
    %c0_i32_1 = arith.constant 0 : i32
    return %arg0, %c0_i32, %c0_i32_0 : i32, i32, i32
  }
}

</mosaic_0001>

<bundles_post_ra>
// kernel: tpu_custom_call.1
= control target key start
LH: loop header
LB: loop body
LE: loop exit
PB: predicated region body
PF: predicated region fallthrough
CT: control target
= control target key end

     0   :  { %8 = vsyncpa [#allocation3], 0  ;;  %s3512_s0 = inlined_call_operand.hbm [shape: f32[2,16,16], index: 0, kind: input, shape index: {}]   ;;  %s3513_s1 = inlined_call_operand.hbm [shape: bf16[432,384], index: 1, kind: input, shape index: {}]   ;;  %s3514_s2 = inlined_call_operand.hbm [shape: bf16[2064,128], index: 2, kind: input, shape index: {}]   ;;  %s3515_s3 = inlined_call_operand.hbm [shape: f32[2,1,128], index: 3, kind: output, shape index: {}]  }
   0x1   :  { %10 = vsyncpa [#allocation3 + $0x1], 0 }
   0x2   :  { %11 = vsyncpa [#allocation6], 0 }
   0x3   :  { %12 = vsyncpa [#allocation4], 0 }
   0x4   :  { %14 = vsyncpa [#allocation4 + $0x1], 0  ;;  %s3183_s12 = smov 0   ;;  %s3185_s13 = smov 0  }
   0x5   :  { %s3187_s14 = smov 0   ;;  %s3189_s15 = smov 0  }
   0x6 LB: > { %s3204_s16 = sadd.s32 4294967295, %s3148_s15   ;;  %s2331_s17 = sadd.s32 4294967294, %s3148_s15   ;;  %s3148_s15 = sphi %s3189_s15, %s3535_s15   ;;  %s3144_s14 = sphi %s3187_s14, %s3534_s14   ;;  %s3140_s13 = sphi %s3185_s13, %s3533_s13   ;;  %s3136_s12 = sphi %s3183_s12, %s3532_s12  }
   0x7   : > { %p40_p0 = scmp.ne.s32.totalorder %s3140_s13, %s3136_s12  ;;  %p3516_p1 = scmp.eq.s32.totalorder %s3204_s16, 0 }
   0x8   : > { %p112_p3 = scmp.eq.s32.totalorder %s2331_s17, 1  ;;  %p2332_p5 = scmp.ge.s32.totalorder %s3148_s15, 1 }
   0x9   : > { %p3213_p4 = por %p3516_p1, %p40_p0  ;;  %p119_p7 = scmp.lt.s32.totalorder %s3148_s15, 3 }
   0xa   : > { %p3218_p6 = por %p112_p3, %p40_p0  ;;  %s3150_s21 = smov [#allocation5]  }
   0xb   : > { %s3519_s18 = scalar_select %p3213_p4, 1, 0 }
   0xc   : > { %s3520_s19 = scalar_select %p3218_p6, 1, 0 }
   0xd   : > { %p3223_p8 = pnand %p2332_p5, %p119_p7  ;;  %s131_s22 = sshll.u32 %s3150_s21, 4  ;;  %s3227_s22 = int_to_ptr.vmem [resolvable:$true] %s131_s22 }
   0xe   : > { %s3151_s24 = smov [#allocation7]   ;;  %s2992_s28 = scalar_lea.hbm %s3513_s1, 10368 }
   0xf   : > { %p2724_p9 = pneg %p3223_p8  ;;  %s144_s25 = sshll.u32 %s3151_s24, 4  ;;  %s3238_s25 = int_to_ptr.vmem [resolvable:$true] %s144_s25 }
  0x10   : > { %p2993_p12 = scmp.ne.s32.totalorder %s3513_s1, %s2992_s28  ;;  %p2999_p5 = scmp.lt.u32.totalorder %s2992_s28, %s3513_s1 }
  0x11   : > { %p3234_p11 = pnand %p2724_p9, %p3516_p1 }
  0x13   : > { %p2994_p13 = pneg %p3234_p11 }
  0x15   : > { %p2995_p0 = pnand %p2994_p13, %p2993_p12 }
  0x17   : > { %p2996_p3 = pneg %p2995_p0 }
  0x19   : > { %p3001_p7 = pnand %p2999_p5, %p2996_p3 }
  0x1b   : > { %3004 = shalt.err (!%p3001_p7)
}
  0x1c   : > { %s3005_s6 = scalar_lea.vmem %s3227_s22, 10368  ;;  %p3013_p2 = scmp.lt.s32.totalorder %s3227_s22, %s3227_s22 }
  0x1d   : > { %p3006_p9 = scmp.ne.s32.totalorder %s3227_s22, %s3005_s6  ;;  %p3014_p12 = scmp.lt.s32.totalorder %s3005_s6, %s3005_s6 }
  0x1f   : > { %p3008_p10 = pnand %p3006_p9, %p2994_p13  ;;  %p3015_p0 = por %p3014_p12, %p3013_p2 }
  0x21   : > { %p3009_p1 = pneg %p3008_p10 }
  0x23   : > { %p3016_p6 = pnand %p3015_p0, %p3009_p1 }
  0x25   : > { %3019 = shalt.err (!%p3016_p6)
}
  0x26   : > { %s3152_s7 = smov 192   ;;  %s3153_s8 = smov 12  }
  0x27   : > { %2727 = dma.hbm_to_vmem [thread:$0]  (!%p3234_p11), %s3513_s1, 10368, %s3227_s22, [#allocation6], %s3152_s7, %s3152_s7, %s3153_s8  }
  0x28   : > { %s3020_s21 = scalar_lea.hbm %s3514_s2, 16512 }
  0x29   : > { %p3021_p2 = scmp.ne.s32.totalorder %s3514_s2, %s3020_s21  ;;  %p3027_p10 = scmp.lt.u32.totalorder %s3020_s21, %s3514_s2 }
  0x2b   : > { %p3023_p1 = pnand %p3021_p2, %p2994_p13 }
  0x2d   : > { %p3024_p6 = pneg %p3023_p1 }
  0x2f   : > { %p3029_p3 = pnand %p3027_p10, %p3024_p6 }
  0x31   : > { %3032 = shalt.err (!%p3029_p3)
}
  0x32   : > { %s3033_s22 = scalar_lea.vmem %s3238_s25, 16512  ;;  %p3041_p12 = scmp.lt.s32.totalorder %s3238_s25, %s3238_s25 }
  0x33   : > { %p3034_p5 = scmp.ne.s32.totalorder %s3238_s25, %s3033_s22  ;;  %p3042_p0 = scmp.lt.s32.totalorder %s3033_s22, %s3033_s22 }
  0x35   : > { %p3036_p7 = pnand %p3034_p5, %p2994_p13  ;;  %p3043_p2 = por %p3042_p0, %p3041_p12 }
  0x37   : > { %p3037_p9 = pneg %p3036_p7 }
  0x39   : > { %p3044_p1 = pnand %p3043_p2, %p3037_p9 }
  0x3b   : > { %3047 = shalt.err (!%p3044_p1)
}
  0x3c   : > { %s3154_s29 = smov 64   ;;  %s3155_s30 = smov 4  }
  0x3d   : > { %2730 = dma.hbm_to_vmem [thread:$0]  (!%p3234_p11), %s3514_s2, 16512, %s3238_s25, [#allocation6], %s3154_s29, %s3154_s29, %s3155_s30  }
  0x3e   : > { %s3293_s6 = sadd.s32 1, %s3148_s15   ;;  %s27_s8 = sadd.s32 1, %s3144_s14 }
  0x3f   : > { %s24_s7 = ssub.s32 %s3148_s15, %s3293_s6  ;;  %p34_p6 = scmp.ne.s32.totalorder %s3144_s14, %s3140_s13 }
  0x40   : > { %p25_p13 = scmp.eq.s32.totalorder %s24_s7, 0  ;;  %p35_p10 = scmp.eq.s32.totalorder %s3148_s15, 0 }
  0x41   : > { %p3523_p5 = scmp.eq.s32.totalorder %s3204_s16, 1  ;;  %p2741_p9 = scmp.lt.s32.totalorder %s3148_s15, 2 }
  0x42   : > { %s3302_s9 = scalar_select %p25_p13, %s3144_s14, %s27_s8  }
  0x43   : > { %p36_p3 = por %p35_p10, %p34_p6  ;;  %p3306_p7 = por %p3523_p5, %p34_p6 }
  0x44   : > { %s158_s23 = sand.u32 1, %s3144_s14   ;;  %s2527_s25 = sshll.u32 %s3148_s15, 8 }
  0x45   : > { %s3524_s10 = scalar_select %p3306_p7, 1, 0 }
  0x46   : > { %s2336_s11 = sshll.u32 %s158_s23, 4  ;;  %s3316_s24 = scalar_lea.hbm %s3512_s0, %s2527_s25 }
  0x47   : > { %s162_s26 = scalar_lea.vmem [#allocation2], %s2336_s11  ;;  %p3320_p11 = pnand %p2741_p9, %p36_p3 }
  0x48   : > { %s169_s27 = sshll.u32 %s162_s26, 4  ;;  %s3324_s22 = scalar_lea.sflag [#allocation3], %s158_s23  ;;  %s3318_s27 = int_to_ptr.vmem [resolvable:$true] %s169_s27 }
  0x49   : > { %s3048_s29 = scalar_lea.hbm %s3316_s24, 256  ;;  %p3050_p0 = pneg %p3320_p11 }
  0x4a   : > { %p3049_p12 = scmp.ne.s32.totalorder %s3316_s24, %s3048_s29  ;;  %s3053_s5 = scalar_lea.hbm %s3512_s0, 512 }
  0x4b   : > { %p3054_p13 = scmp.lt.u32.totalorder %s3316_s24, %s3512_s0  ;;  %p3055_p6 = scmp.lt.u32.totalorder %s3053_s5, %s3048_s29 }
  0x4c   : > { %p3051_p2 = pnand %p3050_p0, %p3049_p12  ;;  %p3057_p3 = scmp.lt.u32.totalorder %s3048_s29, %s3316_s24 }
  0x4d   : > { %p3056_p10 = por %p3055_p6, %p3054_p13 }
  0x4e   : > { %p3052_p1 = pneg %p3051_p2 }
  0x4f   : > { %p3058_p5 = por %p3057_p3, %p3056_p10 }
  0x51   : > { %p3059_p9 = pnand %p3058_p5, %p3052_p1 }
  0x53   : > { %3062 = shalt.err (!%p3059_p9)
}
  0x54   : > { %s3063_s23 = scalar_lea.vmem %s3318_s27, 256  ;;  %s3156_s11 = smov [#allocation2]  }
  0x55   : > { %p3064_p12 = scmp.ne.s32.totalorder %s3318_s27, %s3063_s23  ;;  %s3068_s25 = sshll.u32 %s3156_s11, 4  ;;  %s3069_s25 = int_to_ptr.vmem [resolvable:$false] %s3068_s25 }
  0x56   : > { %s3070_s17 = scalar_lea.vmem %s3069_s25, 512  ;;  %p3071_p4 = scmp.lt.s32.totalorder %s3318_s27, %s3069_s25 }
  0x57   : > { %p3066_p2 = pnand %p3064_p12, %p3050_p0  ;;  %p3072_p13 = scmp.lt.s32.totalorder %s3070_s17, %s3063_s23 }
  0x59   : > { %p3067_p7 = pneg %p3066_p2  ;;  %p3073_p6 = por %p3072_p13, %p3071_p4 }
  0x5b   : > { %p3074_p10 = pnand %p3073_p6, %p3067_p7 }
  0x5d   : > { %3077 = shalt.err (!%p3074_p10)
}
  0x5e   : > { %s3157_s21 = smov 128   ;;  %s3158_s26 = smov 8  }
  0x5f   : > { %2734 = dma.hbm_to_vmem [thread:$0]  (!%p3320_p11), %s3316_s24, 256, %s3318_s27, %s3324_s22, %s3157_s21, %s3157_s21, %s3158_s26  }
  0x60   : > { %181 = sbr.rel (%p3223_p8) target bundleno = 1357 (0x54d), region = 32  ;;  %s3355_s29 = sand.u32 (!%p3223_p8), 1, %s3140_s13  }
  0x61   : > { %s2340_s30 = sshll.u32 (!%p3223_p8), %s3355_s29, 4  ;;  %s184_s4 = scalar_lea.sflag (!%p3223_p8), [#allocation3], %s3355_s29 }
  0x62   : > { %s187_s5 = scalar_lea.vmem (!%p3223_p8), [#allocation2], %s2340_s30  ;;  %p3526_p4 = scmp.ne.s32.totalorder (!%p3223_p8), %s3519_s18, 0 }
  0x67   : > { %3123 = dma.done.wait (%p3526_p4), %s184_s4, 256  }
  0x68   : > { %3125 = vsyncadd (%p3526_p4), %s184_s4, 4294967040  ;;  %p3527_p7 = scmp.eq.s32.totalorder %s3204_s16, 0 }
  0x6a   : > { %3127 = dma.done.wait (%p3527_p7), [#allocation6], 26880   ;;  %p3528_p11 = pmov %p3527_p7 }
  0x6b   : > { %v3159_v0 = vmov 0   ;;  %v2788_v1 = vld [vmem:[#allocation5 + $0x4] ss:$12 sps:$4 sm:$0xff]   ;;  %v2790_v2 = vld [vmem:[#allocation5] ss:$12 sps:$4 sm:$0xff]   ;;  %vm264_vm0 = vcmask 130048   ;;  %v220_v32 = vlaneseq }
  0x6c   : > { %3129 = vsyncadd (%p3528_p11), [#allocation6], 4294940416  ;;  %300 = vmatprep.mubr.bf16.mxu1 %v3159_v0  ;;  %488 = vmatprep.mubr.bf16.mxu0 %v3159_v0  ;;  %v218_v3 = vld [vmem:[%s187_s5] sm:$0xff]  ;;  %v219_v4 = vld [vmem:[%s187_s5 + $0x8] sm:$0xff]  ;;  %v3160_v23 = vmov 0.0   ;;  %vm3161_vm1 = vmmov 0  }
  0x6d   : > { %268 = vmatprep.subr.bf16.mxu1 %v2788_v1  ;;  %v247_v5 = vpack.c.bf16 %v219_v4, %v218_v3  ;;  %v2791_v6 = vld [vmem:[#allocation5 + $0x34] ss:$12 sps:$4 sm:$0xff]   ;;  %v2793_v7 = vld [vmem:[#allocation5 + $0x30] ss:$12 sps:$4 sm:$0xff]   ;;  %v2794_v8 = vld [vmem:[#allocation5 + $0x4c] ss:$12 sps:$4 sm:$0xff]  }
  0x6e   : > { %269 = vmatpush1.bf16.msra.mxu1 %v2790_v2  ;;  %456 = vmatprep.subr.bf16.mxu0 %v2791_v6  ;;  %v2796_v9 = vld [vmem:[#allocation5 + $0x48] ss:$12 sps:$4 sm:$0xff]   ;;  %v2797_v10 = vld [vmem:[#allocation5 + $0x64] ss:$12 sps:$4 sm:$0xff]   ;;  %v2799_v11 = vld [vmem:[#allocation5 + $0x60] ss:$12 sps:$4 sm:$0xff]  }
  0x6f   : > { %457 = vmatpush1.bf16.msra.mxu0 %v2793_v7  ;;  %v2800_v12 = vld [vmem:[#allocation5 + $0x7c] ss:$12 sps:$4 sm:$0xff]   ;;  %v2802_v13 = vld [vmem:[#allocation5 + $0x78] ss:$12 sps:$4 sm:$0xff]   ;;  %v2803_v14 = vld [vmem:[#allocation5 + $0x94] ss:$12 sps:$4 sm:$0xff]   ;;  %2706 = vmatprep.subr.bf16.mxu1 %v3160_v23 }
  0x70   : > { %458 = vmatprep.subr.bf16.mxu0 %v2794_v8  ;;  %v2805_v15 = vld [vmem:[#allocation5 + $0x90] ss:$12 sps:$4 sm:$0xff]   ;;  %v2806_v16 = vld [vmem:[#allocation5 + $0xac] ss:$12 sps:$4 sm:$0xff]   ;;  %v2808_v17 = vld [vmem:[#allocation5 + $0xa8] ss:$12 sps:$4 sm:$0xff]  }
  0x71   : > { %2346 = vmatmul.mubr.msk.bf16.vlgmr.msra.gmra.mrb[0].mxu1 %vm264_vm0, %v247_v5  ;;  %v2809_v18 = vld [vmem:[#allocation5 + $0xc4] ss:$12 sps:$4 sm:$0xff]   ;;  %v2811_v19 = vld [vmem:[#allocation5 + $0xc0] ss:$12 sps:$4 sm:$0xff]   ;;  %v2812_v20 = vld [vmem:[#allocation5 + $0xdc] ss:$12 sps:$4 sm:$0xff]  }
  0x72   : > { %v2814_v21 = vld [vmem:[#allocation5 + $0xd8] ss:$12 sps:$4 sm:$0xff]   ;;  %v2815_v22 = vld [vmem:[#allocation5 + $0x8] ss:$12 sps:$4 sm:$0xff]   ;;  %v2816_v24 = vld [vmem:[#allocation5 + $0xf0] ss:$12 sps:$4 sm:$0xff]   ;;  %2708 = vmatprep.mubr.msk.bf16.mxu1 %vm3161_vm1, %v3160_v23 }
  0x73   : > { %459 = vmatpush1.bf16.msra.mxu0 %v2796_v9  ;;  %2707 = vmatpush3.bf16.msra.mxu1 %v2815_v22  ;;  %v2818_v25 = vld [vmem:[#allocation5 + $0xf4] ss:$12 sps:$4 sm:$0xff]   ;;  %v2821_v26 = vld [vmem:[#allocation5 + $0x10c] ss:$12 sps:$4 sm:$0xff]   ;;  %v2824_v28 = vld [vmem:[#allocation5 + $0x124] ss:$12 sps:$4 sm:$0xff]  }
  0x74   : > { %460 = vmatprep.subr.bf16.mxu0 %v2797_v10  ;;  %636 = vmatprep.subr.bf16.mxu1 %v2818_v25  ;;  %v2819_v27 = vld [vmem:[#allocation5 + $0x108] ss:$12 sps:$4 sm:$0xff]   ;;  %v2822_v29 = vld [vmem:[#allocation5 + $0x120] ss:$12 sps:$4 sm:$0xff]   ;;  %v2825_v31 = vld [vmem:[#allocation5 + $0x138] ss:$12 sps:$4 sm:$0xff]  }
  0x75   : > { %v2827_v30 = vld [vmem:[#allocation5 + $0x13c] ss:$12 sps:$4 sm:$0xff]   ;;  %v3372_v33 = vshrl.u32 %v220_v32, 7  ;;  %v3374_v34 = vld [vmem:[#allocation5 + $0x18] ss:$408 sps:$4 sm:$0xff]   ;;  %s2524_s18 = sshll.u32 %s3204_s16, 4 }
  0x76   : > { %v3377_v36 = vunpack.c.l.bf16 %v3374_v34  ;;  %v2830_v54 = vld [vmem:[#allocation5 + $0x154] ss:$12 sps:$4 sm:$0xff]   ;;  %v2828_v55 = vld [vmem:[#allocation5 + $0x150] ss:$12 sps:$4 sm:$0xff]   ;;  %v2833_v57 = vld [vmem:[#allocation5 + $0x16c] ss:$12 sps:$4 sm:$0xff]   ;;  %s3468_s22 = scalar_lea.hbm %s3515_s3, %s2524_s18 }
  0x77   : > { %461 = vmatpush1.bf16.msra.mxu0 %v2799_v11  ;;  %v363_v37 = vsub.s32 0, %v3372_v33  ;;  %vm354_vm2 = vcmp.lt.s32.totalorder %v3372_v33, 1  ;;  %vm245_vm3 = vcmp.ge.s32.totalorder %v3372_v33, 1  ;;  %v2831_v59 = vld [vmem:[#allocation5 + $0x168] ss:$12 sps:$4 sm:$0xff]   ;;  %vm681_vm4 = vcmp.lt.s32.totalorder %v3372_v33, 2 }
  0x78   : > { %462 = vmatprep.subr.bf16.mxu0 %v2800_v12  ;;  %v2836_v62 = vld [vmem:[#allocation5 + $0x184] ss:$12 sps:$4 sm:$0xff]   ;;  %v2834_v63 = vld [vmem:[#allocation5 + $0x180] ss:$12 sps:$4 sm:$0xff]   ;;  %v2839_v1 = vld [vmem:[#allocation5 + $0x19c] ss:$12 sps:$4 sm:$0xff]  }
  0x79   : > { %2709 = vmatmul.mubr.msk.bf16.vlgmr.msra.gmra.mrb[4].mxu1 %vm264_vm0, %v247_v5  ;;  %v364_v43 = vrot.slane %v3377_v36, %v363_v37  ;;  %v2837_v2 = vld [vmem:[#allocation5 + $0x198] ss:$12 sps:$4 sm:$0xff]   ;;  %v2843_v5 = vld [vmem:[#allocation5 + $0x1e0] ss:$12 sps:$4 sm:$0xff]   ;;  %v2848_v6 = vld [vmem:[#allocation5 + $0x1fc] ss:$12 sps:$4 sm:$0xff]  }
  0x7a   : > { %637 = vmatpush1.bf16.msra.mxu1 %v2816_v24  ;;  %668 = vmatprep.mubr.bf16.mxu1 %v3159_v0  ;;  %v2842_v3 = vld [vmem:[#allocation5 + $0x1cc] ss:$12 sps:$4 sm:$0xff]   ;;  %v2845_v4 = vld [vmem:[#allocation5 + $0x1e4] ss:$12 sps:$4 sm:$0xff]   ;;  %v2851_v8 = vld [vmem:[#allocation5 + $0x214] ss:$12 sps:$4 sm:$0xff]  }
  0x7b   : > { %463 = vmatpush1.bf16.msra.mxu0 %v2802_v13  ;;  %638 = vmatprep.subr.bf16.mxu1 %v2821_v26  ;;  %v2846_v7 = vld [vmem:[#allocation5 + $0x1f8] ss:$12 sps:$4 sm:$0xff]   ;;  %v2849_v9 = vld [vmem:[#allocation5 + $0x210] ss:$12 sps:$4 sm:$0xff]   ;;  %v2852_v11 = vld [vmem:[#allocation5 + $0x228] ss:$12 sps:$4 sm:$0xff]  }
  0x7c   : > { %464 = vmatprep.subr.bf16.mxu0 %v2803_v14  ;;  %v2854_v10 = vld [vmem:[#allocation5 + $0x22c] ss:$12 sps:$4 sm:$0xff]   ;;  %v509_v13 = vsub.s32 1, %v3372_v33  ;;  %v371_v14 = vsub.s32 2, %v3372_v33  ;;  %vm553_vm5 = vcmp.ge.s32.totalorder %v3372_v33, 2  ;;  %s216_s20 = scalar_lea.vmem [#allocation8], %s3355_s29 }
  0x7d   : > { %s2246_s24 = sshll.u32 %s216_s20, 4  ;;  %s2234_s7 = scalar_lea.sflag [#allocation4], %s3355_s29  ;;  %s3470_s24 = int_to_ptr.vmem [resolvable:$true] %s2246_s24 }
  0x7e   : > { %639 = vmatpush1.bf16.msra.mxu1 %v2819_v27  ;;  %s3078_s8 = scalar_lea.vmem %s3470_s24, 16  ;;  %p3529_p0 = scmp.ne.s32.totalorder %s3524_s10, 0 }
  0x7f   : > { %465 = vmatpush1.bf16.msra.mxu0 %v2805_v15  ;;  %640 = vmatprep.subr.bf16.mxu1 %v2824_v28  ;;  %p3079_p8 = scmp.ne.s32.totalorder %s3470_s24, %s3078_s8  ;;  %s3162_s16 = smov [#allocation8]  }
  0x80   : > { %466 = vmatprep.subr.bf16.mxu0 %v2806_v16  ;;  %s3082_s23 = sshll.u32 %s3162_s16, 4  ;;  %s3083_s23 = int_to_ptr.vmem [resolvable:$false] %s3082_s23 }
  0x81   : > { %p3080_p1 = pnand %p3079_p8, %p3529_p0  ;;  %s3084_s11 = scalar_lea.vmem %s3083_s23, 32 }
  0x82   : > { %641 = vmatpush1.bf16.msra.mxu1 %v2822_v29  ;;  %p3085_p5 = scmp.lt.s32.totalorder %s3470_s24, %s3083_s23  ;;  %p3086_p9 = scmp.lt.s32.totalorder %s3084_s11, %s3078_s8 }
  0x83   : > { %467 = vmatpush1.bf16.msra.mxu0 %v2808_v17  ;;  %642 = vmatprep.subr.bf16.mxu1 %v2827_v30  ;;  %p3081_p3 = pneg %p3080_p1 }
  0x84   : > { %468 = vmatprep.subr.bf16.mxu0 %v2809_v18  ;;  %p3087_p12 = por %p3086_p9, %p3085_p5 }
  0x86   : > { %643 = vmatpush1.bf16.msra.mxu1 %v2825_v31  ;;  %p3088_p2 = pnand %p3087_p12, %p3081_p3 }
  0x87   : > { %469 = vmatpush1.bf16.msra.mxu0 %v2811_v19  ;;  %644 = vmatprep.subr.bf16.mxu1 %v2830_v54 }
  0x88   : > { %470 = vmatprep.subr.bf16.mxu0 %v2812_v20  ;;  %v510_v20 = vrot.slane %v3377_v36, %v509_v13 }
  0x8a   : > { %645 = vmatpush1.bf16.msra.mxu1 %v2828_v55  ;;  %v552_v55 = vunpack.c.h.bf16 %v3374_v34 }
  0x8b   : > { %471 = vmatpush1.bf16.msra.mxu0 %v2814_v21  ;;  %646 = vmatprep.subr.bf16.mxu1 %v2833_v57  ;;  %v372_v21 = vrot.slane %v3377_v36, %v371_v14  ;;  %v2877_v14 = vld [vmem:[#allocation7 + $0xd8] sm:$0xff]  }
  0x8c   : > { %777 = vmatprep.subr.bf16.mxu0 %v2842_v3 }
  0x8e   : > { %647 = vmatpush1.bf16.msra.mxu1 %v2831_v59 }
  0x8f   : > { %648 = vmatprep.subr.bf16.mxu1 %v2836_v62 }
  0x92   : > { %649 = vmatpush1.bf16.msra.mxu1 %v2834_v63 }
  0x93   : > { %650 = vmatprep.subr.bf16.mxu1 %v2839_v1 }
  0x96   : > { %651 = vmatpush1.bf16.msra.mxu1 %v2837_v2 }
 0x144   : > { %v302_v35 = vpop.f32.mrb[0].mxu1 }
 0x145   : > { %v304_v38 = vpop.f32.mrb[1].mxu1  ;;  %v352_v40 = vrot.slane %v302_v35, 7 }
 0x146   : > { %v306_v39 = vpop.f32.mrb[2].mxu1 }
 0x147   : > { %v353_v41 = vrot.slane %v306_v39, 7  ;;  %v308_v42 = vpop.f32.mrb[3].mxu1 }
 0x149   : > { %v356_v44 = vsel %vm354_vm2, %v353_v41, %v352_v40  ;;  %v355_v45 = vsel %vm354_vm2, %v352_v40, %v353_v41  ;;  %v2857_v41 = vld [vmem:[#allocation5 + $0x244] ss:$12 sps:$4 sm:$0xff]  }
 0x14a   : > { %v357_v46 = vsel %vm245_vm3, %v356_v44, 0.0  ;;  %v360_v47 = vadd.f32 %v355_v45, %v308_v42  ;;  %v2855_v42 = vld [vmem:[#allocation5 + $0x240] ss:$12 sps:$4 sm:$0xff]   ;;  %v2858_v44 = vld [vmem:[#allocation5 + $0x258] ss:$12 sps:$4 sm:$0xff]  }
 0x14b   : > { %v359_v48 = vadd.f32 %v357_v46, %v304_v38  ;;  %v2863_v45 = vld [vmem:[#allocation5 + $0x274] ss:$12 sps:$4 sm:$0xff]   ;;  %v2861_v46 = vld [vmem:[#allocation5 + $0x270] ss:$12 sps:$4 sm:$0xff]  }
 0x14c   : > { %v366_v49 = vadd.f32 %v364_v43, %v360_v47  ;;  %v345_v56 = vpop.f32.mrb[4].mxu1  ;;  %v2864_v47 = vld [vmem:[#allocation7 + $0x40] sm:$0xff]  }
 0x14d   : > { %v365_v50 = vadd.f32 %v364_v43, %v359_v48  ;;  %v2710_v58 = vpop.f32.mrb[5].mxu1  ;;  %v373_v31 = vadd.f32 %v372_v21, %v345_v56  ;;  %v2860_v43 = vld [vmem:[#allocation5 + $0x25c] ss:$12 sps:$4 sm:$0xff]   ;;  %2530 = vmatprep.subr.bf16.mxu1 %v2864_v47 }
 0x14e   : > { %v368_v51 = vmax.f32 %v366_v49, 0.0  ;;  %v348_v60 = vpop.f32.mrb[6].mxu1  ;;  %v2865_v48 = vld [vmem:[#allocation7 + $0xc0] sm:$0xff]  }
 0x14f   : > { %v367_v52 = vmax.f32 %v365_v50, 0.0  ;;  %v2711_v61 = vpop.f32.mrb[7].mxu1  ;;  %v374_v28 = vadd.f32 %v372_v21, %v348_v60  ;;  %v2866_v49 = vld [vmem:[#allocation7] sm:$0xff]   ;;  %v2868_v50 = vld [vmem:[#allocation7 + $0x48] sm:$0xff]  }
 0x150   : > { %v691_v61 = vrot.slane %v552_v55, %v363_v37  ;;  %v2871_v37 = vld [vmem:[#allocation7 + $0x88] sm:$0xff]  }
 0x151   : > { %v375_v53 = vpack.c.bf16 %v368_v51, %v367_v52  ;;  %v2870_v51 = vld [vmem:[#allocation7 + $0x8] sm:$0xff]   ;;  %v2872_v52 = vld [vmem:[#allocation7 + $0x50] sm:$0xff]  }
 0x152   : > { %v2884_v21 = vld [vmem:[#allocation7 + $0x68] sm:$0xff]  }
 0x153   : > { %489 = vmatmul.mubr.bf16.vlgmr.msra.gmra.mrb[0].mxu0 %v375_v53  ;;  %v2874_v53 = vld [vmem:[#allocation7 + $0x10] sm:$0xff]  }
 0x154   : > { %809 = vmatprep.mubr.bf16.mxu0 %v3159_v0  ;;  %v2840_v0 = vld [vmem:[#allocation5 + $0x1c8] ss:$12 sps:$4 sm:$0xff]  }
 0x155   : > { %778 = vmatpush1.bf16.msra.mxu0 %v2840_v0 }
 0x156   : > { %779 = vmatprep.subr.bf16.mxu0 %v2845_v4 }
 0x159   : > { %780 = vmatpush1.bf16.msra.mxu0 %v2843_v5 }
 0x15a   : > { %781 = vmatprep.subr.bf16.mxu0 %v2848_v6 }
 0x15d   : > { %782 = vmatpush1.bf16.msra.mxu0 %v2846_v7  ;;  %v2867_v7 = vld [vmem:[#allocation7 + $0x80] sm:$0xff]  }
 0x15e   : > { %783 = vmatprep.subr.bf16.mxu0 %v2851_v8 }
 0x161   : > { %784 = vmatpush1.bf16.msra.mxu0 %v2849_v9  ;;  %v2869_v9 = vld [vmem:[#allocation7 + $0xc8] sm:$0xff]  }
 0x162   : > { %785 = vmatprep.subr.bf16.mxu0 %v2854_v10  ;;  %v2873_v10 = vld [vmem:[#allocation7 + $0xd0] sm:$0xff]  }
 0x165   : > { %786 = vmatpush1.bf16.msra.mxu0 %v2852_v11  ;;  %v2875_v11 = vld [vmem:[#allocation7 + $0x90] sm:$0xff]  }
 0x166   : > { %787 = vmatprep.subr.bf16.mxu0 %v2857_v41  ;;  %v2897_v41 = vld [vmem:[#allocation7 + $0x1c0] sm:$0xff]  }
 0x169   : > { %788 = vmatpush1.bf16.msra.mxu0 %v2855_v42 }
 0x16a   : > { %789 = vmatprep.subr.bf16.mxu0 %v2860_v43 }
 0x16d   : > { %790 = vmatpush1.bf16.msra.mxu0 %v2858_v44 }
 0x16e   : > { %791 = vmatprep.subr.bf16.mxu0 %v2863_v45 }
 0x171   : > { %792 = vmatpush1.bf16.msra.mxu0 %v2861_v46 }
 0x172   : > { %2552 = vmatprep.subr.bf16.mxu0 %v2865_v48 }
 0x226   : > { %v490_v12 = vpop.f32.mrb[0].mxu0 }
 0x227   : > { %v492_v15 = vpop.f32.mrb[1].mxu0  ;;  %v499_v17 = vrot.slane %v490_v12, 7  ;;  %v2876_v12 = vld [vmem:[#allocation7 + $0x58] sm:$0xff]  }
 0x228   : > { %v494_v16 = vpop.f32.mrb[2].mxu0 }
 0x229   : > { %v500_v18 = vrot.slane %v494_v16, 7  ;;  %v496_v19 = vpop.f32.mrb[3].mxu0  ;;  %v2879_v16 = vld [vmem:[#allocation7 + $0x98] sm:$0xff]  }
 0x22b   : > { %v502_v22 = vsel %vm354_vm2, %v500_v18, %v499_v17  ;;  %v501_v23 = vsel %vm354_vm2, %v499_v17, %v500_v18  ;;  %v2880_v17 = vld [vmem:[#allocation7 + $0x60] sm:$0xff]  }
 0x22c   : > { %v503_v24 = vsel %vm245_vm3, %v502_v22, 0.0  ;;  %v506_v25 = vadd.f32 %v501_v23, %v496_v19  ;;  %v2881_v18 = vld [vmem:[#allocation7 + $0xe0] sm:$0xff]   ;;  %v2885_v22 = vld [vmem:[#allocation7 + $0xe8] sm:$0xff]  }
 0x22d   : > { %v505_v26 = vadd.f32 %v503_v24, %v492_v15  ;;  %v2878_v15 = vld [vmem:[#allocation7 + $0x18] sm:$0xff]   ;;  %v2882_v19 = vld [vmem:[#allocation7 + $0x20] sm:$0xff]   ;;  %v2886_v23 = vld [vmem:[#allocation7 + $0x28] sm:$0xff]  }
 0x22e   : > { %v512_v27 = vadd.f32 %v510_v20, %v506_v25  ;;  %v2887_v24 = vld [vmem:[#allocation7 + $0xa8] sm:$0xff]   ;;  %v2888_v25 = vld [vmem:[#allocation7 + $0x70] sm:$0xff]  }
 0x22f   : > { %v511_v29 = vadd.f32 %v510_v20, %v505_v26  ;;  %v2883_v20 = vld [vmem:[#allocation7 + $0xa0] sm:$0xff]   ;;  %v2889_v26 = vld [vmem:[#allocation7 + $0xf0] sm:$0xff]  }
 0x230   : > { %v514_v30 = vmax.f32 %v512_v27, 0.0  ;;  %v2890_v27 = vld [vmem:[#allocation7 + $0x30] sm:$0xff]  }
 0x231   : > { %v513_v32 = vmax.f32 %v511_v29, 0.0  ;;  %v2892_v29 = vld [vmem:[#allocation7 + $0x78] sm:$0xff]  }
 0x232   : > { %v3404_v35 = vadd.f32 %v514_v30, %v374_v28  ;;  %v2891_v28 = vld [vmem:[#allocation7 + $0xb0] sm:$0xff]   ;;  %v2893_v30 = vld [vmem:[#allocation7 + $0xf8] sm:$0xff]  }
 0x233   : > { %v3406_v36 = vadd.f32 %v513_v32, %v373_v31  ;;  %v2894_v31 = vld [vmem:[#allocation7 + $0x38] sm:$0xff]  }
 0x234   : > { %v518_v38 = vmax.f32 %v3404_v35, 0.0  ;;  %v2895_v32 = vld [vmem:[#allocation7 + $0xb8] sm:$0xff]  }
 0x235   : > { %v517_v39 = vmax.f32 %v3406_v36, 0.0 }
 0x237   : > { %v555_v40 = vpack.c.bf16 %v518_v38, %v517_v39 }
 0x239   : > { %669 = vmatmul.mubr.bf16.vlgmr.msra.gmra.mrb[8].mxu1 %v555_v40  ;;  %v2896_v40 = vld [vmem:[#allocation7 + $0x140] sm:$0xff]  }
 0x23a   : > { %2531 = vmatpush3.bf16.msra.mxu1 %v2866_v49 }
 0x23b   : > { %2532 = vmatprep.subr.bf16.mxu1 %v2868_v50  ;;  %v831_v50 = vrot.slane %v552_v55, %v509_v13 }
 0x23e   : > { %2533 = vmatpush3.bf16.msra.mxu1 %v2870_v51 }
 0x23f   : > { %2534 = vmatprep.subr.bf16.mxu1 %v2872_v52 }
 0x242   : > { %2535 = vmatpush3.bf16.msra.mxu1 %v2874_v53 }
 0x243   : > { %2536 = vmatprep.subr.bf16.mxu1 %v2876_v12  ;;  %v2911_v12 = vld [vmem:[#allocation7 + $0x198] sm:$0xff]  }
 0x246   : > { %2537 = vmatpush3.bf16.msra.mxu1 %v2878_v15  ;;  %v2913_v15 = vld [vmem:[#allocation7 + $0x1e0] sm:$0xff]  }
 0x247   : > { %2538 = vmatprep.subr.bf16.mxu1 %v2880_v17  ;;  %v2914_v17 = vld [vmem:[#allocation7 + $0x120] sm:$0xff]  }
 0x24a   : > { %2539 = vmatpush3.bf16.msra.mxu1 %v2882_v19  ;;  %v2916_v19 = vld [vmem:[#allocation7 + $0x168] sm:$0xff]  }
 0x24b   : > { %2540 = vmatprep.subr.bf16.mxu1 %v2884_v21 }
 0x24e   : > { %2541 = vmatpush3.bf16.msra.mxu1 %v2886_v23  ;;  %v2919_v23 = vld [vmem:[#allocation7 + $0x1a8] sm:$0xff]  }
 0x24f   : > { %2542 = vmatprep.subr.bf16.mxu1 %v2888_v25  ;;  %v2921_v25 = vld [vmem:[#allocation7 + $0x1f0] sm:$0xff]  }
 0x252   : > { %2543 = vmatpush3.bf16.msra.mxu1 %v2890_v27  ;;  %v2922_v27 = vld [vmem:[#allocation7 + $0x130] sm:$0xff]  }
 0x253   : > { %2544 = vmatprep.subr.bf16.mxu1 %v2892_v29  ;;  %v2924_v29 = vld [vmem:[#allocation7 + $0x178] sm:$0xff]  }
 0x256   : > { %2545 = vmatpush3.bf16.msra.mxu1 %v2894_v31 }
 0x257   : > { %2574 = vmatprep.subr.bf16.mxu1 %v2896_v40  ;;  %v2927_v40 = vld [vmem:[#allocation7 + $0x1b8] sm:$0xff]  }
 0x30c   : > { %v670_v54 = vpop.f32.mrb[8].mxu1 }
 0x30d   : > { %v672_v56 = vpop.f32.mrb[9].mxu1  ;;  %v679_v58 = vrot.slane %v670_v54, 6 }
 0x30e   : > { %v674_v57 = vpop.f32.mrb[10].mxu1 }
 0x30f   : > { %v680_v59 = vrot.slane %v674_v57, 6  ;;  %v676_v60 = vpop.f32.mrb[11].mxu1 }
 0x311   : > { %v683_v62 = vsel %vm681_vm4, %v680_v59, %v679_v58  ;;  %v682_v63 = vsel %vm681_vm4, %v679_v58, %v680_v59 }
 0x312   : > { %v684_v1 = vsel %vm553_vm5, %v683_v62, 0.0  ;;  %v687_v2 = vadd.f32 %v682_v63, %v676_v60  ;;  %v2898_v63 = vld [vmem:[#allocation7 + $0x100] sm:$0xff]  }
 0x313   : > { %v686_v0 = vadd.f32 %v684_v1, %v672_v56  ;;  %v2899_v1 = vld [vmem:[#allocation7 + $0x180] sm:$0xff]  }
 0x314   : > { %v693_v3 = vadd.f32 %v691_v61, %v687_v2  ;;  %v2901_v2 = vld [vmem:[#allocation7 + $0x1c8] sm:$0xff]  }
 0x315   : > { %v692_v4 = vadd.f32 %v691_v61, %v686_v0 }
 0x316   : > { %v695_v5 = vmax.f32 %v693_v3, 0.0 }
 0x317   : > { %v694_v6 = vmax.f32 %v692_v4, 0.0  ;;  %v2902_v4 = vld [vmem:[#allocation7 + $0x108] sm:$0xff]  }
 0x319   : > { %v696_v8 = vpack.c.bf16 %v695_v5, %v694_v6  ;;  %v2903_v5 = vld [vmem:[#allocation7 + $0x188] sm:$0xff]   ;;  %v2904_v6 = vld [vmem:[#allocation7 + $0x150] sm:$0xff]  }
 0x31b   : > { %810 = vmatmul.mubr.bf16.vlgmr.msra.gmra.mrb[4].mxu0 %v696_v8  ;;  %v2906_v8 = vld [vmem:[#allocation7 + $0x110] sm:$0xff]  }
 0x31c   : > { %2553 = vmatpush3.bf16.msra.mxu0 %v2867_v7  ;;  %v2905_v7 = vld [vmem:[#allocation7 + $0x1d0] sm:$0xff]  }
 0x31d   : > { %2554 = vmatprep.subr.bf16.mxu0 %v2869_v9  ;;  %v2907_v9 = vld [vmem:[#allocation7 + $0x190] sm:$0xff]  }
 0x320   : > { %2555 = vmatpush3.bf16.msra.mxu0 %v2871_v37  ;;  %v2908_v37 = vld [vmem:[#allocation7 + $0x158] sm:$0xff]  }
 0x321   : > { %2556 = vmatprep.subr.bf16.mxu0 %v2873_v10  ;;  %v2909_v10 = vld [vmem:[#allocation7 + $0x1d8] sm:$0xff]  }
 0x324   : > { %2557 = vmatpush3.bf16.msra.mxu0 %v2875_v11  ;;  %v2910_v11 = vld [vmem:[#allocation7 + $0x118] sm:$0xff]  }
 0x325   : > { %2558 = vmatprep.subr.bf16.mxu0 %v2877_v14  ;;  %v2912_v14 = vld [vmem:[#allocation7 + $0x160] sm:$0xff]  }
 0x328   : > { %2559 = vmatpush3.bf16.msra.mxu0 %v2879_v16 }
 0x329   : > { %2560 = vmatprep.subr.bf16.mxu0 %v2881_v18  ;;  %v2915_v18 = vld [vmem:[#allocation7 + $0x1a0] sm:$0xff]  }
 0x32c   : > { %2561 = vmatpush3.bf16.msra.mxu0 %v2883_v20  ;;  %v2917_v20 = vld [vmem:[#allocation7 + $0x1e8] sm:$0xff]  }
 0x32d   : > { %2562 = vmatprep.subr.bf16.mxu0 %v2885_v22  ;;  %v2918_v22 = vld [vmem:[#allocation7 + $0x128] sm:$0xff]  }
 0x330   : > { %2563 = vmatpush3.bf16.msra.mxu0 %v2887_v24  ;;  %v2920_v24 = vld [vmem:[#allocation7 + $0x170] sm:$0xff]  }
 0x331   : > { %2564 = vmatprep.subr.bf16.mxu0 %v2889_v26 }
 0x334   : > { %2565 = vmatpush3.bf16.msra.mxu0 %v2891_v28  ;;  %v2923_v28 = vld [vmem:[#allocation7 + $0x1b0] sm:$0xff]  }
 0x335   : > { %2566 = vmatprep.subr.bf16.mxu0 %v2893_v30  ;;  %v2925_v30 = vld [vmem:[#allocation7 + $0x1f8] sm:$0xff]  }
 0x338   : > { %2567 = vmatpush3.bf16.msra.mxu0 %v2895_v32  ;;  %v2926_v32 = vld [vmem:[#allocation7 + $0x138] sm:$0xff]  }
 0x339   : > { %2596 = vmatprep.subr.bf16.mxu0 %v2897_v41 }
 0x3ee   : > { %v811_v42 = vpop.f32.mrb[4].mxu0 }
 0x3ef   : > { %v813_v43 = vpop.f32.mrb[5].mxu0  ;;  %v820_v45 = vrot.slane %v811_v42, 6  ;;  %v2929_v42 = vld [vmem:[#allocation7 + $0x2c0] sm:$0xff]  }
 0x3f0   : > { %v815_v44 = vpop.f32.mrb[6].mxu0 }
 0x3f1   : > { %v821_v46 = vrot.slane %v815_v44, 6  ;;  %v817_v47 = vpop.f32.mrb[7].mxu0 }
 0x3f3   : > { %v823_v48 = vsel %vm681_vm4, %v821_v46, %v820_v45  ;;  %v822_v49 = vsel %vm681_vm4, %v820_v45, %v821_v46  ;;  %v2930_v45 = vld [vmem:[#allocation7 + $0x200] sm:$0xff]  }
 0x3f4   : > { %v824_v51 = vsel %vm553_vm5, %v823_v48, 0.0  ;;  %v827_v52 = vadd.f32 %v822_v49, %v817_v47  ;;  %v2931_v48 = vld [vmem:[#allocation7 + $0x280] sm:$0xff]  }
 0x3f5   : > { %v826_v53 = vadd.f32 %v824_v51, %v813_v43  ;;  %v2933_v51 = vld [vmem:[#allocation7 + $0x2c8] sm:$0xff]  }
 0x3f6   : > { %v833_v16 = vadd.f32 %v831_v50, %v827_v52 }
 0x3f7   : > { %v832_v54 = vadd.f32 %v831_v50, %v826_v53  ;;  %v2932_v50 = vld [vmem:[#allocation7 + $0x248] sm:$0xff]  }
 0x3f8   : > { %v835_v21 = vmax.f32 %v833_v16, 0.0  ;;  %v2934_v53 = vld [vmem:[#allocation7 + $0x208] sm:$0xff]  }
 0x3f9   : > { %v834_v56 = vmax.f32 %v832_v54, 0.0  ;;  %v2935_v54 = vld [vmem:[#allocation7 + $0x288] sm:$0xff]  }
 0x3fa   : > { %v837_v26 = vadd.f32 %v835_v21, %v518_v38  ;;  %v2928_v38 = vld [vmem:[#allocation7 + $0x240] sm:$0xff]   ;;  %v2965_v21 = vld [vmem:[#allocation7 + $0x3c8] sm:$0xff]  }
 0x3fb   : > { %v836_v57 = vadd.f32 %v834_v56, %v517_v39  ;;  %v2900_v39 = vld [vmem:[#allocation7 + $0x148] sm:$0xff]   ;;  %v2936_v56 = vld [vmem:[#allocation7 + $0x250] sm:$0xff]  }
 0x3fc   : > { %v3450_v31 = vmax.f32 %v837_v26, 0.0  ;;  %v2969_v26 = vld [vmem:[#allocation7 + $0x3d0] sm:$0xff]  }
 0x3fd   : > { %v3439_v58 = vmax.f32 %v836_v57, 0.0  ;;  %v2937_v57 = vld [vmem:[#allocation7 + $0x2d0] sm:$0xff]  }
 0x3fe   : > { %v856_v43 = vrot.slane %v3450_v31, 1  ;;  %v860_v44 = vrot.slane %v3450_v31, 3  ;;  %v1136_v16 = vpack.c.bf16 %v3450_v31, %v3450_v31 }
 0x3ff   : > { %v841_v59 = vrot.slane %v3439_v58, 1  ;;  %v845_v60 = vrot.slane %v3439_v58, 3  ;;  %v843_v61 = vrot.slane %v3439_v58, 2  ;;  %v849_v34 = vrot.slane %v3439_v58, 5 }
 0x400   : > { %v853_v33 = vrot.slane %v3439_v58, 7  ;;  %v1128_v36 = vpack.c.bf16 %v3439_v58, %v3439_v58  ;;  %v847_v41 = vrot.slane %v3439_v58, 4  ;;  %v851_v35 = vrot.slane %v3439_v58, 6  ;;  %v2938_v58 = vld [vmem:[#allocation7 + $0x210] sm:$0xff]  }
 0x401   : > { %v1129_v13 = vpack.c.bf16 %v841_v59, %v841_v59  ;;  %v1131_v55 = vpack.c.bf16 %v845_v60, %v845_v60  ;;  %v1130_v62 = vpack.c.bf16 %v843_v61, %v843_v61  ;;  %v1133_v0 = vpack.c.bf16 %v849_v34, %v849_v34  ;;  %v2939_v59 = vld [vmem:[#allocation7 + $0x290] sm:$0xff]   ;;  %v2940_v60 = vld [vmem:[#allocation7 + $0x258] sm:$0xff]  }
 0x402   : > { %v1135_v3 = vpack.c.bf16 %v853_v33, %v853_v33  ;;  %v1132_v46 = vpack.c.bf16 %v847_v41, %v847_v41  ;;  %v1134_v47 = vpack.c.bf16 %v851_v35, %v851_v35  ;;  %v1137_v49 = vpack.c.bf16 %v856_v43, %v856_v43  ;;  %v2941_v61 = vld [vmem:[#allocation7 + $0x2d8] sm:$0xff]   ;;  %v2976_v41 = vld [vmem:[#allocation7 + $0x360] sm:$0xff]   ;;  %v2980_v43 = vld [vmem:[#allocation7 + $0x368] sm:$0xff]  }
 0x403   : > { %1944 = vmatprep.mubr.bf16.mxu1 %v1129_v13  ;;  %1984 = vmatprep.mubr.bf16.mxu0 %v1131_v55  ;;  %v1139_v52 = vpack.c.bf16 %v860_v44, %v860_v44  ;;  %v2942_v34 = vld [vmem:[#allocation7 + $0x218] sm:$0xff]   ;;  %v2944_v13 = vld [vmem:[#allocation7 + $0x260] sm:$0xff]   ;;  %v2981_v44 = vld [vmem:[#allocation7 + $0x3e8] sm:$0xff]  }
 0x404   : > { %1945 = vmatmul.mubr.bf16.vlgmr.msra.gmra.mrb[12].mxu1 %v1128_v36  ;;  %1985 = vmatmul.mubr.bf16.vlgmr.msra.gmra.mrb[8].mxu0 %v1130_v62  ;;  %v2943_v33 = vld [vmem:[#allocation7 + $0x298] sm:$0xff]   ;;  %v2945_v55 = vld [vmem:[#allocation7 + $0x2e0] sm:$0xff]   ;;  %v2949_v36 = vld [vmem:[#allocation7 + $0x2e8] sm:$0xff]  }
 0x405   : > { %2575 = vmatpush3.bf16.msra.mxu1 %v2898_v63  ;;  %2597 = vmatpush3.bf16.msra.mxu0 %v2899_v1  ;;  %v2946_v62 = vld [vmem:[#allocation7 + $0x220] sm:$0xff]   ;;  %v2948_v1 = vld [vmem:[#allocation7 + $0x268] sm:$0xff]  }
 0x406   : > { %2024 = vmatprep.mubr.bf16.mxu1 %v1133_v0  ;;  %2064 = vmatprep.mubr.bf16.mxu0 %v1135_v3  ;;  %v2947_v63 = vld [vmem:[#allocation7 + $0x2a0] sm:$0xff]   ;;  %v2952_v0 = vld [vmem:[#allocation7 + $0x270] sm:$0xff]  }
 0x407   : > { %2576 = vmatprep.subr.bf16.mxu1 %v2900_v39  ;;  %2598 = vmatprep.subr.bf16.mxu0 %v2901_v2  ;;  %v2950_v39 = vld [vmem:[#allocation7 + $0x228] sm:$0xff]   ;;  %v2953_v3 = vld [vmem:[#allocation7 + $0x2f0] sm:$0xff]   ;;  %v2977_v35 = vld [vmem:[#allocation7 + $0x3e0] sm:$0xff]  }
 0x408   : > { %v2951_v2 = vld [vmem:[#allocation7 + $0x2a8] sm:$0xff]  }
 0x409   : > { %2577 = vmatpush3.bf16.msra.mxu1 %v2902_v4  ;;  %2599 = vmatpush3.bf16.msra.mxu0 %v2903_v5  ;;  %v2954_v4 = vld [vmem:[#allocation7 + $0x230] sm:$0xff]  }
 0x40a   : > { %2578 = vmatprep.subr.bf16.mxu1 %v2904_v6  ;;  %2600 = vmatprep.subr.bf16.mxu0 %v2905_v7  ;;  %v2955_v5 = vld [vmem:[#allocation7 + $0x2b0] sm:$0xff]   ;;  %v2956_v6 = vld [vmem:[#allocation7 + $0x278] sm:$0xff]  }
 0x40b   : > { %v2957_v7 = vld [vmem:[#allocation7 + $0x2f8] sm:$0xff]  }
 0x40d   : > { %2579 = vmatpush3.bf16.msra.mxu1 %v2906_v8  ;;  %2601 = vmatpush3.bf16.msra.mxu0 %v2907_v9  ;;  %v2958_v8 = vld [vmem:[#allocation7 + $0x238] sm:$0xff]  }
 0x40e   : > { %2580 = vmatprep.subr.bf16.mxu1 %v2908_v37  ;;  %2602 = vmatprep.subr.bf16.mxu0 %v2909_v10  ;;  %v2959_v9 = vld [vmem:[#allocation7 + $0x2b8] sm:$0xff]   ;;  %v2960_v37 = vld [vmem:[#allocation7 + $0x340] sm:$0xff]   ;;  %v858_v10 = vrot.slane %v3450_v31, 2 }
 0x411   : > { %2581 = vmatpush3.bf16.msra.mxu1 %v2910_v11  ;;  %2603 = vmatpush3.bf16.msra.mxu0 %v2911_v12  ;;  %v2961_v11 = vld [vmem:[#allocation7 + $0x3c0] sm:$0xff]   ;;  %v864_v12 = vrot.slane %v3450_v31, 5 }
 0x412   : > { %2582 = vmatprep.subr.bf16.mxu1 %v2912_v14  ;;  %2604 = vmatprep.subr.bf16.mxu0 %v2913_v15  ;;  %v2962_v14 = vld [vmem:[#allocation7 + $0x300] sm:$0xff]   ;;  %v868_v15 = vrot.slane %v3450_v31, 7 }
 0x415   : > { %2583 = vmatpush3.bf16.msra.mxu1 %v2914_v17  ;;  %2605 = vmatpush3.bf16.msra.mxu0 %v2915_v18  ;;  %v2963_v17 = vld [vmem:[#allocation7 + $0x380] sm:$0xff]   ;;  %v1138_v18 = vpack.c.bf16 %v858_v10, %v858_v10 }
 0x416   : > { %2584 = vmatprep.subr.bf16.mxu1 %v2916_v19  ;;  %2606 = vmatprep.subr.bf16.mxu0 %v2917_v20  ;;  %v2964_v19 = vld [vmem:[#allocation7 + $0x348] sm:$0xff]   ;;  %v1141_v20 = vpack.c.bf16 %v864_v12, %v864_v12 }
 0x419   : > { %2585 = vmatpush3.bf16.msra.mxu1 %v2918_v22  ;;  %2607 = vmatpush3.bf16.msra.mxu0 %v2919_v23  ;;  %v1143_v22 = vpack.c.bf16 %v868_v15, %v868_v15  ;;  %v2966_v23 = vld [vmem:[#allocation7 + $0x308] sm:$0xff]  }
 0x41a   : > { %2586 = vmatprep.subr.bf16.mxu1 %v2920_v24  ;;  %2608 = vmatprep.subr.bf16.mxu0 %v2921_v25  ;;  %v2967_v24 = vld [vmem:[#allocation7 + $0x388] sm:$0xff]   ;;  %v2968_v25 = vld [vmem:[#allocation7 + $0x350] sm:$0xff]  }
 0x41d   : > { %2587 = vmatpush3.bf16.msra.mxu1 %v2922_v27  ;;  %2609 = vmatpush3.bf16.msra.mxu0 %v2923_v28  ;;  %v2970_v27 = vld [vmem:[#allocation7 + $0x310] sm:$0xff]  }
 0x41e   : > { %2588 = vmatprep.subr.bf16.mxu1 %v2924_v29  ;;  %2610 = vmatprep.subr.bf16.mxu0 %v2925_v30  ;;  %v2971_v28 = vld [vmem:[#allocation7 + $0x390] sm:$0xff]   ;;  %v2972_v29 = vld [vmem:[#allocation7 + $0x358] sm:$0xff]  }
 0x41f   : > { %v2973_v30 = vld [vmem:[#allocation7 + $0x3d8] sm:$0xff]  }
 0x421   : > { %2589 = vmatpush3.bf16.msra.mxu1 %v2926_v32  ;;  %2611 = vmatpush3.bf16.msra.mxu0 %v2927_v40  ;;  %v2974_v32 = vld [vmem:[#allocation7 + $0x318] sm:$0xff]  }
 0x422   : > { %2618 = vmatprep.subr.bf16.mxu1 %v2928_v38  ;;  %2640 = vmatprep.subr.bf16.mxu0 %v2929_v42  ;;  %v2975_v40 = vld [vmem:[#allocation7 + $0x398] sm:$0xff]   ;;  %v2978_v38 = vld [vmem:[#allocation7 + $0x320] sm:$0xff]  }
 0x423   : > { %v2979_v42 = vld [vmem:[#allocation7 + $0x3a0] sm:$0xff]  }
 0x424   : > { %2025 = vmatmul.mubr.bf16.vlgmr.msra.gmra.mrb[16].mxu1 %v1132_v46  ;;  %2065 = vmatmul.mubr.bf16.vlgmr.msra.gmra.mrb[12].mxu0 %v1134_v47  ;;  %v2983_v46 = vld [vmem:[#allocation7 + $0x3a8] sm:$0xff]   ;;  %v2984_v47 = vld [vmem:[#allocation7 + $0x370] sm:$0xff]  }
 0x425   : > { %2619 = vmatpush3.bf16.msra.mxu1 %v2930_v45  ;;  %2104 = vmatprep.mubr.bf16.mxu1 %v1137_v49  ;;  %v2982_v45 = vld [vmem:[#allocation7 + $0x328] sm:$0xff]   ;;  %v2986_v49 = vld [vmem:[#allocation7 + $0x330] sm:$0xff]  }
 0x426   : > { %2641 = vmatpush3.bf16.msra.mxu0 %v2931_v48  ;;  %2144 = vmatprep.mubr.bf16.mxu0 %v1139_v52  ;;  %v2985_v48 = vld [vmem:[#allocation7 + $0x3f0] sm:$0xff]   ;;  %v2989_v52 = vld [vmem:[#allocation7 + $0x3f8] sm:$0xff]  }
 0x427   : > { %2620 = vmatprep.subr.bf16.mxu1 %v2932_v50  ;;  %2642 = vmatprep.subr.bf16.mxu0 %v2933_v51  ;;  %v2987_v50 = vld [vmem:[#allocation7 + $0x3b0] sm:$0xff]   ;;  %v2988_v51 = vld [vmem:[#allocation7 + $0x378] sm:$0xff]  }
 0x429   : > { %2621 = vmatpush3.bf16.msra.mxu1 %v2934_v53  ;;  %v2990_v53 = vld [vmem:[#allocation7 + $0x338] sm:$0xff]  }
 0x42a   : > { %2643 = vmatpush3.bf16.msra.mxu0 %v2935_v54  ;;  %2622 = vmatprep.subr.bf16.mxu1 %v2936_v56  ;;  %v2991_v54 = vld [vmem:[#allocation7 + $0x3b8] sm:$0xff]   ;;  %v862_v56 = vrot.slane %v3450_v31, 4 }
 0x42b   : > { %2644 = vmatprep.subr.bf16.mxu0 %v2937_v57  ;;  %v866_v57 = vrot.slane %v3450_v31, 6 }
 0x42d   : > { %2623 = vmatpush3.bf16.msra.mxu1 %v2938_v58  ;;  %v1140_v58 = vpack.c.bf16 %v862_v56, %v862_v56 }
 0x42e   : > { %2645 = vmatpush3.bf16.msra.mxu0 %v2939_v59  ;;  %2624 = vmatprep.subr.bf16.mxu1 %v2940_v60  ;;  %v1142_v59 = vpack.c.bf16 %v866_v57, %v866_v57  ;;  %v1126_v60 = vld [vmem:[#allocation7 + $0x400] sm:$0x1] }
 0x42f   : > { %2646 = vmatprep.subr.bf16.mxu0 %v2941_v61 }
 0x431   : > { %2625 = vmatpush3.bf16.msra.mxu1 %v2942_v34 }
 0x432   : > { %2647 = vmatpush3.bf16.msra.mxu0 %v2943_v33  ;;  %2626 = vmatprep.subr.bf16.mxu1 %v2944_v13  ;;  %v1127_v33 = vunpack.c.l.bf16 %v1126_v60 }
 0x433   : > { %2648 = vmatprep.subr.bf16.mxu0 %v2945_v55 }
 0x435   : > { %2627 = vmatpush3.bf16.msra.mxu1 %v2946_v62 }
 0x436   : > { %2649 = vmatpush3.bf16.msra.mxu0 %v2947_v63  ;;  %2628 = vmatprep.subr.bf16.mxu1 %v2948_v1 }
 0x437   : > { %2650 = vmatprep.subr.bf16.mxu0 %v2949_v36 }
 0x439   : > { %2629 = vmatpush3.bf16.msra.mxu1 %v2950_v39 }
 0x43a   : > { %2651 = vmatpush3.bf16.msra.mxu0 %v2951_v2  ;;  %2630 = vmatprep.subr.bf16.mxu1 %v2952_v0 }
 0x43b   : > { %2652 = vmatprep.subr.bf16.mxu0 %v2953_v3 }
 0x43d   : > { %2631 = vmatpush3.bf16.msra.mxu1 %v2954_v4 }
 0x43e   : > { %2653 = vmatpush3.bf16.msra.mxu0 %v2955_v5  ;;  %2632 = vmatprep.subr.bf16.mxu1 %v2956_v6 }
 0x43f   : > { %2654 = vmatprep.subr.bf16.mxu0 %v2957_v7 }
 0x441   : > { %2633 = vmatpush3.bf16.msra.mxu1 %v2958_v8 }
 0x442   : > { %2655 = vmatpush3.bf16.msra.mxu0 %v2959_v9  ;;  %2662 = vmatprep.subr.bf16.mxu1 %v2960_v37 }
 0x443   : > { %2684 = vmatprep.subr.bf16.mxu0 %v2961_v11 }
 0x444   : > { %2105 = vmatmul.mubr.bf16.vlgmr.msra.gmra.mrb[20].mxu1 %v1136_v16 }
 0x445   : > { %2145 = vmatmul.mubr.bf16.vlgmr.msra.gmra.mrb[16].mxu0 %v1138_v18  ;;  %2663 = vmatpush3.bf16.msra.mxu1 %v2962_v14 }
 0x446   : > { %2184 = vmatprep.mubr.bf16.mxu1 %v1141_v20  ;;  %2685 = vmatpush3.bf16.msra.mxu0 %v2963_v17 }
 0x447   : > { %2224 = vmatprep.mubr.bf16.mxu0 %v1143_v22  ;;  %2664 = vmatprep.subr.bf16.mxu1 %v2964_v19 }
 0x448   : > { %2686 = vmatprep.subr.bf16.mxu0 %v2965_v21 }
 0x449   : > { %2665 = vmatpush3.bf16.msra.mxu1 %v2966_v23 }
 0x44a   : > { %2687 = vmatpush3.bf16.msra.mxu0 %v2967_v24  ;;  %2666 = vmatprep.subr.bf16.mxu1 %v2968_v25 }
 0x44b   : > { %2688 = vmatprep.subr.bf16.mxu0 %v2969_v26 }
 0x44d   : > { %2667 = vmatpush3.bf16.msra.mxu1 %v2970_v27 }
 0x44e   : > { %2689 = vmatpush3.bf16.msra.mxu0 %v2971_v28  ;;  %2668 = vmatprep.subr.bf16.mxu1 %v2972_v29 }
 0x44f   : > { %2690 = vmatprep.subr.bf16.mxu0 %v2973_v30 }
 0x451   : > { %2669 = vmatpush3.bf16.msra.mxu1 %v2974_v32 }
 0x452   : > { %2691 = vmatpush3.bf16.msra.mxu0 %v2975_v40  ;;  %2670 = vmatprep.subr.bf16.mxu1 %v2976_v41 }
 0x453   : > { %2692 = vmatprep.subr.bf16.mxu0 %v2977_v35 }
 0x455   : > { %2671 = vmatpush3.bf16.msra.mxu1 %v2978_v38 }
 0x456   : > { %2693 = vmatpush3.bf16.msra.mxu0 %v2979_v42  ;;  %2672 = vmatprep.subr.bf16.mxu1 %v2980_v43 }
 0x457   : > { %2694 = vmatprep.subr.bf16.mxu0 %v2981_v44 }
 0x459   : > { %2673 = vmatpush3.bf16.msra.mxu1 %v2982_v45 }
 0x45a   : > { %2695 = vmatpush3.bf16.msra.mxu0 %v2983_v46  ;;  %2674 = vmatprep.subr.bf16.mxu1 %v2984_v47 }
 0x45b   : > { %2696 = vmatprep.subr.bf16.mxu0 %v2985_v48 }
 0x45d   : > { %2675 = vmatpush3.bf16.msra.mxu1 %v2986_v49 }
 0x45e   : > { %2697 = vmatpush3.bf16.msra.mxu0 %v2987_v50  ;;  %2676 = vmatprep.subr.bf16.mxu1 %v2988_v51 }
 0x45f   : > { %2698 = vmatprep.subr.bf16.mxu0 %v2989_v52 }
 0x461   : > { %2677 = vmatpush3.bf16.msra.mxu1 %v2990_v53 }
 0x462   : > { %2699 = vmatpush3.bf16.msra.mxu0 %v2991_v54 }
 0x464   : > { %2185 = vmatmul.mubr.bf16.vlgmr.msra.gmra.mrb[24].mxu1 %v1140_v58 }
 0x465   : > { %2225 = vmatmul.mubr.bf16.vlgmr.msra.gmra.mrb[20].mxu0 %v1142_v59 }
 0x4d7   : > { %v2546_v61 = vpop.f32.mrb[12].mxu1  ;;  %v2568_v34 = vpop.f32.mrb[8].mxu0 }
 0x4d8   : > { %v2547_v13 = vpop.f32.mrb[13].mxu1  ;;  %v2569_v55 = vpop.f32.mrb[9].mxu0 }
 0x4d9   : > { %v2548_v62 = vadd.f32 %v2547_v13, %v2546_v61  ;;  %v2570_v63 = vadd.f32 %v2569_v55, %v2568_v34  ;;  %v2549_v1 = vpop.f32.mrb[14].mxu1  ;;  %v2571_v36 = vpop.f32.mrb[10].mxu0 }
 0x4da   : > { %v2550_v39 = vpop.f32.mrb[15].mxu1  ;;  %v2572_v2 = vpop.f32.mrb[11].mxu0 }
 0x4db   : > { %v1947_v0 = vadd.f32 %v2548_v62, %v1127_v33 }
 0x4dd   : > { %v1987_v31 = vadd.f32 %v2570_v63, %v1947_v0 }
 0x4f7   : > { %v2590_v3 = vpop.f32.mrb[16].mxu1  ;;  %v2612_v4 = vpop.f32.mrb[12].mxu0 }
 0x4f8   : > { %v2591_v5 = vpop.f32.mrb[17].mxu1  ;;  %v2613_v6 = vpop.f32.mrb[13].mxu0 }
 0x4f9   : > { %v2592_v7 = vadd.f32 %v2591_v5, %v2590_v3  ;;  %v2614_v8 = vadd.f32 %v2613_v6, %v2612_v4  ;;  %v2593_v9 = vpop.f32.mrb[18].mxu1  ;;  %v2615_v37 = vpop.f32.mrb[14].mxu0 }
 0x4fa   : > { %v2594_v10 = vpop.f32.mrb[19].mxu1  ;;  %v2616_v11 = vpop.f32.mrb[15].mxu0 }
 0x4fb   : > { %v2027_v12 = vadd.f32 %v2592_v7, %v1987_v31 }
 0x4fd   : > { %v2067_v14 = vadd.f32 %v2614_v8, %v2027_v12 }
 0x517   : > { %v2634_v15 = vpop.f32.mrb[20].mxu1 }
 0x518   : > { %v2656_v16 = vpop.f32.mrb[16].mxu0  ;;  %v2635_v17 = vpop.f32.mrb[21].mxu1 }
 0x519   : > { %v2636_v18 = vadd.f32 %v2635_v17, %v2634_v15  ;;  %v2657_v19 = vpop.f32.mrb[17].mxu0  ;;  %v2637_v20 = vpop.f32.mrb[22].mxu1 }
 0x51a   : > { %v2658_v21 = vadd.f32 %v2657_v19, %v2656_v16  ;;  %v2659_v22 = vpop.f32.mrb[18].mxu0  ;;  %v2638_v23 = vpop.f32.mrb[23].mxu1 }
 0x51b   : > { %v2107_v24 = vadd.f32 %v2636_v18, %v2067_v14  ;;  %v2660_v25 = vpop.f32.mrb[19].mxu0 }
 0x51d   : > { %v2147_v26 = vadd.f32 %v2658_v21, %v2107_v24 }
 0x537   : > { %v2678_v27 = vpop.f32.mrb[24].mxu1 }
 0x538   : > { %v2700_v28 = vpop.f32.mrb[20].mxu0  ;;  %v2679_v29 = vpop.f32.mrb[25].mxu1 }
 0x539   : > { %v2680_v30 = vadd.f32 %v2679_v29, %v2678_v27  ;;  %v2701_v32 = vpop.f32.mrb[21].mxu0  ;;  %v2681_v40 = vpop.f32.mrb[26].mxu1 }
 0x53a   : > { %v2702_v41 = vadd.f32 %v2701_v32, %v2700_v28  ;;  %v2703_v35 = vpop.f32.mrb[22].mxu0  ;;  %v2682_v38 = vpop.f32.mrb[27].mxu1 }
 0x53b   : > { %v2187_v42 = vadd.f32 %v2680_v30, %v2147_v26  ;;  %v2704_v43 = vpop.f32.mrb[23].mxu0 }
 0x53d   : > { %v2227_v44 = vadd.f32 %v2702_v41, %v2187_v42 }
 0x53f   : > { %2232 = vst [vmem:[%s216_s20] sm:$0x1] %v2227_v44 }
 0x540   : > { %3091 = shalt.err (!%p3088_p2)
}
 0x541   : > { %s3092_s25 = scalar_lea.hbm %s3468_s22, 16  ;;  %s3096_s26 = scalar_lea.hbm %s3515_s3, 32 }
 0x542   : > { %p3093_p13 = scmp.ne.s32.totalorder %s3468_s22, %s3092_s25  ;;  %p3097_p4 = scmp.lt.u32.totalorder %s3468_s22, %s3515_s3 }
 0x543   : > { %p3098_p7 = scmp.lt.u32.totalorder %s3096_s26, %s3092_s25  ;;  %p3100_p8 = scmp.lt.u32.totalorder %s3092_s25, %s3468_s22 }
 0x544   : > { %p3094_p6 = pnand %p3093_p13, %p3529_p0 }
 0x545   : > { %p3099_p11 = por %p3098_p7, %p3097_p4 }
 0x546   : > { %p3095_p10 = pneg %p3094_p6 }
 0x547   : > { %p3101_p1 = por %p3100_p8, %p3099_p11 }
 0x549   : > { %p3102_p3 = pnand %p3101_p1, %p3095_p10 }
 0x54b   : > { %3105 = shalt.err (!%p3102_p3)
}
 0x54c   : > { %2722 = dma.vmem_to_hbm [thread:$0]  (%p3529_p0), %s3470_s24, 16, %s3468_s22, %s2234_s7  }
 0x54d PF: > { %s2258_s4 = sand.u32 1, %s3136_s12   ;;  %p3530_p5 = scmp.ne.s32.totalorder %s3520_s19, 0 }
 0x54e   : > { %p3531_p9 = scmp.ge.s32.totalorder %s3148_s15, 2  ;;  %s2259_s5 = scalar_lea.sflag [#allocation4], %s2258_s4 }
 0x550   : > { %p2736_p12 = pnand %p3531_p9, %p3530_p5 }
 0x552   : > { %3131 = dma.done.wait (!%p2736_p12), %s2259_s5, 16  }
 0x553   : > { %3133 = vsyncadd (!%p2736_p12), %s2259_s5, 4294967280  ;;  %p17_p2 = scmp.ge.s32.totalorder %s3293_s6, 4   ;;  %s3532_s12 = smov %s3140_s13 }
 0x554   : > { %s3533_s13 = smov %s3144_s14  ;;  %s3534_s14 = smov %s3302_s9 }
 0x555   : > { %s3535_s15 = smov %s3293_s6  ;;  %19 = sbr.rel (!%p17_p2) target bundleno = 6 (0x6), region = 85 }
 0x55c   :  { %2263 = vsyncpa [#allocation3], 1 }
 0x55d   :  { %2265 = vsyncpa [#allocation3 + $0x1], 1 }
 0x55e   :  { %2266 = vsyncpa [#allocation6], 1 }
 0x55f   :  { %2267 = vsyncpa [#allocation4], 1 }
 0x560   :  { %2269 = vsyncpa [#allocation4 + $0x1], 1 }

</bundles_post_ra>
